<compile_context>
chip_gen: v7x
topology: tpu7x:2x2x1
jax: 0.10.0
libtpu: 0.0.40
codegen_flags: <defaults>
</compile_context>

<pallas_src>
import jax
import jax.numpy as jnp
import numpy as np
from jax import lax
from jax.experimental import pallas as pl
from jax.experimental.pallas import tpu as pltpu


def _masked_bit_reverse(x, idx, bits, flag, axis):
    """Conditionally (flag != 0) complement the given index `bits` along `axis`.

    Complementing a contiguous set of bit positions of an index is exactly an
    in-group reversal (e.g. complementing bits [0, log2(W)) of the flattened
    H*W lane index reverses w inside every W-group; bits [log2(W), log2(HW))
    reverse the H group order).  Each bit is one swap stage: every element
    exchanges with its partner 2^j away, chosen by bit j of the index.
    Only static rolls (two static slices + a concatenate), integer compares and
    selects are used -> guaranteed Mosaic lowering, all XLU/VPU work, hidden
    under the HBM DMA of this copy kernel.
    """
    apply = (jnp.zeros_like(idx) + flag) != 0            # full-shape bool mask
    for j in bits:
        sh = 1 << j
        up = jnp.roll(x, -sh, axis=axis)                 # up[i] = x[i + sh]
        dn = jnp.roll(x, sh, axis=axis)                  # dn[i] = x[i - sh]
        swapped = jnp.where(((idx >> j) & 1) == 0, up, dn)   # = x[i ^ sh]
        x = jnp.where(apply, swapped, x)
    return x


def _make_flip_kernel(D, H, W):
    lw = W.bit_length() - 1          # lane bits [0, lw)        -> W flip
    lh = H.bit_length() - 1          # lane bits [lw, lw+lh)    -> H flip
    ld = D.bit_length() - 1          # sublane bits [0, ld)     -> D flip

    def kernel(flags_ref, x_ref, o_ref):
        x = x_ref[...]                                    # (BC_TILE, D, H*W)
        nd = x.ndim
        lane = lax.broadcasted_iota(jnp.int32, x.shape, nd - 1)
        sub = lax.broadcasted_iota(jnp.int32, x.shape, nd - 2)
        # W flip (reverse within each W-group of the flattened lane axis).
        x = _masked_bit_reverse(x, lane, range(0, lw), flags_ref[2], axis=nd - 1)
        # H flip (reverse the order of the W-groups).
        x = _masked_bit_reverse(x, lane, range(lw, lw + lh), flags_ref[1], axis=nd - 1)
        # D flip (reverse the sublane axis).
        x = _masked_bit_reverse(x, sub, range(0, ld), flags_ref[0], axis=nd - 2)
        o_ref[...] = x

    return kernel


def simple_flip3d(voxels: jax.Array, flags: jax.Array,
                  *, max_block_bytes: int = 4 * 1024 * 1024) -> jax.Array:
    """Pallas equivalent of SimpleFlip3D.forward given precomputed flip flags.

    voxels: (B, C, D, H, W)
    flags:  (3,) int, nonzero -> flip that axis ([-3, -2, -1] i.e. [D, H, W])
    """
    B, C, D, H, W = voxels.shape
    for n, name in ((D, "D"), (H, "H"), (W, "W")):
        if n & (n - 1):
            # TODO(synk): non-power-of-two spatial dims need a concat-of-slices
            # reversal instead of the bit-complement swap network.
            raise ValueError(f"{name}={n} must be a power of two")

    BC, HW = B * C, H * W
    dt = voxels.dtype
    x = voxels.reshape(BC, D, HW)     # free reshape; lane dim = H*W (lane-dense)

    # Largest divisor of B*C whose (BC_TILE, D, HW) slab is <= max_block_bytes,
    # so 2x input + 2x output pipeline buffers stay well inside VMEM (incl.
    # v7x's 64 MiB) while amortizing per-grid-step overhead.
    slab = D * HW * dt.itemsize
    bc_tile = 1
    for t in range(1, BC + 1):
        if BC % t == 0 and t * slab <= max_block_bytes:
            bc_tile = t

    flags = flags.astype(jnp.int32)

    out = pl.pallas_call(
        _make_flip_kernel(D, H, W),
        out_shape=jax.ShapeDtypeStruct((BC, D, HW), dt),
        grid_spec=pltpu.PrefetchScalarGridSpec(
            num_scalar_prefetch=1,
            grid=(BC // bc_tile,),
            in_specs=[pl.BlockSpec((bc_tile, D, HW), lambda i, flags: (i, 0, 0))],
            out_specs=pl.BlockSpec((bc_tile, D, HW), lambda i, flags: (i, 0, 0)),
        ),
        # Pure mem-bound copy: ~0 flops, 2x tensor bytes of HBM traffic.
        cost_estimate=pl.CostEstimate(
            flops=0, transcendentals=0,
            bytes_accessed=2 * BC * D * HW * dt.itemsize),
        compiler_params=pltpu.CompilerParams(
            # Output blocks are fully independent; on v7x this axis can be
            # sharded across both TensorCores with pltpu.CORE_PARALLEL — kept
            # as "parallel" here for portability across v5e/v6e/v7x.
            dimension_semantics=("parallel",)),
    )(flags, x)

    return out.reshape(B, C, D, H, W)


def _reference(voxels, flags):
    out = voxels
    for i, axis in enumerate([-3, -2, -1]):
        if bool(flags[i]):
            out = jnp.flip(out, axis=axis)
    return out


if __name__ == "__main__":
    key = jax.random.PRNGKey(0)
    k_data, k_flip = jax.random.split(key)

    B, C, D, H, W = 2, 4, 8, 16, 16
    voxels = jax.random.normal(k_data, (B, C, D, H, W), dtype=jnp.float32)

    # Flip decisions (host-side randomness in the torch module); p = 0.5.
    p = 0.5
    flags = (jax.random.uniform(k_flip, (3,)) < p).astype(jnp.int32)

    out = jax.block_until_ready(simple_flip3d(voxels, flags))
    assert out.shape == voxels.shape and out.dtype == voxels.dtype
    assert np.array_equal(np.asarray(out), np.asarray(_reference(voxels, flags))), \
        "mismatch vs reference flip"

    # Exhaustive check over all 8 flag combinations (same compiled kernel).
    for fd in (0, 1):
        for fh in (0, 1):
            for fw in (0, 1):
                f = jnp.array([fd, fh, fw], dtype=jnp.int32)
                o = jax.block_until_ready(simple_flip3d(voxels, f))
                assert np.array_equal(np.asarray(o), np.asarray(_reference(voxels, f))), \
                    f"mismatch for flags {(fd, fh, fw)}"

    print("KERNEL_OK")
</pallas_src>

<mosaic_0001>
module attributes {stable_mosaic.version = 11 : i64} {
  func.func @kernel(%arg0: i32, %arg1: memref<3xi32, #tpu.memory_space<smem>>, %arg2: memref<8x8x256xf32, #tpu.memory_space<vmem>>, %arg3: memref<8x8x256xf32, #tpu.memory_space<vmem>>) attributes {dimension_semantics = [#tpu.dimension_semantics<parallel>], iteration_bounds = array<i64: 1>, scalar_prefetch = 1 : i64, scratch_operands = 0 : i64, tpu.core_type = #tpu.core_type<tc>, window_params = [{transform_indices = @transform_0, window_bounds = array<i64: 8, 8, 256>}, {transform_indices = @transform_1, window_bounds = array<i64: 8, 8, 256>}]} {
    %c0 = arith.constant 0 : index
    %c0_0 = arith.constant 0 : index
    %c0_1 = arith.constant 0 : index
    %0 = vector.load %arg2[%c0, %c0_0, %c0_1] : memref<8x8x256xf32, #tpu.memory_space<vmem>>, vector<8x8x256xf32>
    %1 = tpu.iota {dimensions = array<i32: 2>} : vector<8x8x256xi32>
    %2 = tpu.iota {dimensions = array<i32: 1>} : vector<8x8x256xi32>
    %c2 = arith.constant 2 : index
    %3 = memref.load %arg1[%c2] : memref<3xi32, #tpu.memory_space<smem>>
    %c0_i32 = arith.constant 0 : i32
    %4 = vector.broadcast %c0_i32 : i32 to vector<8x8x256xi32>
    %5 = vector.broadcast %3 : i32 to vector<8x8x256xi32>
    %6 = arith.addi %4, %5 : vector<8x8x256xi32>
    %c0_i32_2 = arith.constant 0 : i32
    %7 = vector.broadcast %c0_i32_2 : i32 to vector<8x8x256xi32>
    %8 = arith.cmpi ne, %6, %7 : vector<8x8x256xi32>
    %9 = vector.extract_strided_slice %0 {offsets = [0, 0, 1], sizes = [8, 8, 255], strides = [1, 1, 1]} : vector<8x8x256xf32> to vector<8x8x255xf32>
    %10 = vector.extract_strided_slice %0 {offsets = [0, 0, 0], sizes = [8, 8, 1], strides = [1, 1, 1]} : vector<8x8x256xf32> to vector<8x8x1xf32>
    %11 = tpu.concatenate %9, %10 in 2 : vector<8x8x255xf32>, vector<8x8x1xf32> -> vector<8x8x256xf32>
    %12 = vector.extract_strided_slice %0 {offsets = [0, 0, 255], sizes = [8, 8, 1], strides = [1, 1, 1]} : vector<8x8x256xf32> to vector<8x8x1xf32>
    %13 = vector.extract_strided_slice %0 {offsets = [0, 0, 0], sizes = [8, 8, 255], strides = [1, 1, 1]} : vector<8x8x256xf32> to vector<8x8x255xf32>
    %14 = tpu.concatenate %12, %13 in 2 : vector<8x8x1xf32>, vector<8x8x255xf32> -> vector<8x8x256xf32>
    %c0_i32_3 = arith.constant 0 : i32
    %15 = vector.broadcast %c0_i32_3 : i32 to vector<8x8x256xi32>
    %16 = arith.shrsi %1, %15 : vector<8x8x256xi32>
    %c1_i32 = arith.constant 1 : i32
    %17 = vector.broadcast %c1_i32 : i32 to vector<8x8x256xi32>
    %18 = arith.andi %16, %17 : vector<8x8x256xi32>
    %c0_i32_4 = arith.constant 0 : i32
    %19 = vector.broadcast %c0_i32_4 : i32 to vector<8x8x256xi32>
    %20 = arith.cmpi eq, %18, %19 : vector<8x8x256xi32>
    %21 = arith.select %20, %11, %14 : vector<8x8x256xi1>, vector<8x8x256xf32>
    %22 = arith.select %8, %21, %0 : vector<8x8x256xi1>, vector<8x8x256xf32>
    %23 = vector.extract_strided_slice %22 {offsets = [0, 0, 2], sizes = [8, 8, 254], strides = [1, 1, 1]} : vector<8x8x256xf32> to vector<8x8x254xf32>
    %24 = vector.extract_strided_slice %22 {offsets = [0, 0, 0], sizes = [8, 8, 2], strides = [1, 1, 1]} : vector<8x8x256xf32> to vector<8x8x2xf32>
    %25 = tpu.concatenate %23, %24 in 2 : vector<8x8x254xf32>, vector<8x8x2xf32> -> vector<8x8x256xf32>
    %26 = vector.extract_strided_slice %22 {offsets = [0, 0, 254], sizes = [8, 8, 2], strides = [1, 1, 1]} : vector<8x8x256xf32> to vector<8x8x2xf32>
    %27 = vector.extract_strided_slice %22 {offsets = [0, 0, 0], sizes = [8, 8, 254], strides = [1, 1, 1]} : vector<8x8x256xf32> to vector<8x8x254xf32>
    %28 = tpu.concatenate %26, %27 in 2 : vector<8x8x2xf32>, vector<8x8x254xf32> -> vector<8x8x256xf32>
    %c1_i32_5 = arith.constant 1 : i32
    %29 = vector.broadcast %c1_i32_5 : i32 to vector<8x8x256xi32>
    %30 = arith.shrsi %1, %29 : vector<8x8x256xi32>
    %c1_i32_6 = arith.constant 1 : i32
    %31 = vector.broadcast %c1_i32_6 : i32 to vector<8x8x256xi32>
    %32 = arith.andi %30, %31 : vector<8x8x256xi32>
    %c0_i32_7 = arith.constant 0 : i32
    %33 = vector.broadcast %c0_i32_7 : i32 to vector<8x8x256xi32>
    %34 = arith.cmpi eq, %32, %33 : vector<8x8x256xi32>
    %35 = arith.select %34, %25, %28 : vector<8x8x256xi1>, vector<8x8x256xf32>
    %36 = arith.select %8, %35, %22 : vector<8x8x256xi1>, vector<8x8x256xf32>
    %37 = vector.extract_strided_slice %36 {offsets = [0, 0, 4], sizes = [8, 8, 252], strides = [1, 1, 1]} : vector<8x8x256xf32> to vector<8x8x252xf32>
    %38 = vector.extract_strided_slice %36 {offsets = [0, 0, 0], sizes = [8, 8, 4], strides = [1, 1, 1]} : vector<8x8x256xf32> to vector<8x8x4xf32>
    %39 = tpu.concatenate %37, %38 in 2 : vector<8x8x252xf32>, vector<8x8x4xf32> -> vector<8x8x256xf32>
    %40 = vector.extract_strided_slice %36 {offsets = [0, 0, 252], sizes = [8, 8, 4], strides = [1, 1, 1]} : vector<8x8x256xf32> to vector<8x8x4xf32>
    %41 = vector.extract_strided_slice %36 {offsets = [0, 0, 0], sizes = [8, 8, 252], strides = [1, 1, 1]} : vector<8x8x256xf32> to vector<8x8x252xf32>
    %42 = tpu.concatenate %40, %41 in 2 : vector<8x8x4xf32>, vector<8x8x252xf32> -> vector<8x8x256xf32>
    %c2_i32 = arith.constant 2 : i32
    %43 = vector.broadcast %c2_i32 : i32 to vector<8x8x256xi32>
    %44 = arith.shrsi %1, %43 : vector<8x8x256xi32>
    %c1_i32_8 = arith.constant 1 : i32
    %45 = vector.broadcast %c1_i32_8 : i32 to vector<8x8x256xi32>
    %46 = arith.andi %44, %45 : vector<8x8x256xi32>
    %c0_i32_9 = arith.constant 0 : i32
    %47 = vector.broadcast %c0_i32_9 : i32 to vector<8x8x256xi32>
    %48 = arith.cmpi eq, %46, %47 : vector<8x8x256xi32>
    %49 = arith.select %48, %39, %42 : vector<8x8x256xi1>, vector<8x8x256xf32>
    %50 = arith.select %8, %49, %36 : vector<8x8x256xi1>, vector<8x8x256xf32>
    %51 = vector.extract_strided_slice %50 {offsets = [0, 0, 8], sizes = [8, 8, 248], strides = [1, 1, 1]} : vector<8x8x256xf32> to vector<8x8x248xf32>
    %52 = vector.extract_strided_slice %50 {offsets = [0, 0, 0], sizes = [8, 8, 8], strides = [1, 1, 1]} : vector<8x8x256xf32> to vector<8x8x8xf32>
    %53 = tpu.concatenate %51, %52 in 2 : vector<8x8x248xf32>, vector<8x8x8xf32> -> vector<8x8x256xf32>
    %54 = vector.extract_strided_slice %50 {offsets = [0, 0, 248], sizes = [8, 8, 8], strides = [1, 1, 1]} : vector<8x8x256xf32> to vector<8x8x8xf32>
    %55 = vector.extract_strided_slice %50 {offsets = [0, 0, 0], sizes = [8, 8, 248], strides = [1, 1, 1]} : vector<8x8x256xf32> to vector<8x8x248xf32>
    %56 = tpu.concatenate %54, %55 in 2 : vector<8x8x8xf32>, vector<8x8x248xf32> -> vector<8x8x256xf32>
    %c3_i32 = arith.constant 3 : i32
    %57 = vector.broadcast %c3_i32 : i32 to vector<8x8x256xi32>
    %58 = arith.shrsi %1, %57 : vector<8x8x256xi32>
    %c1_i32_10 = arith.constant 1 : i32
    %59 = vector.broadcast %c1_i32_10 : i32 to vector<8x8x256xi32>
    %60 = arith.andi %58, %59 : vector<8x8x256xi32>
    %c0_i32_11 = arith.constant 0 : i32
    %61 = vector.broadcast %c0_i32_11 : i32 to vector<8x8x256xi32>
    %62 = arith.cmpi eq, %60, %61 : vector<8x8x256xi32>
    %63 = arith.select %62, %53, %56 : vector<8x8x256xi1>, vector<8x8x256xf32>
    %64 = arith.select %8, %63, %50 : vector<8x8x256xi1>, vector<8x8x256xf32>
    %c1 = arith.constant 1 : index
    %65 = memref.load %arg1[%c1] : memref<3xi32, #tpu.memory_space<smem>>
    %c0_i32_12 = arith.constant 0 : i32
    %66 = vector.broadcast %c0_i32_12 : i32 to vector<8x8x256xi32>
    %67 = vector.broadcast %65 : i32 to vector<8x8x256xi32>
    %68 = arith.addi %66, %67 : vector<8x8x256xi32>
    %c0_i32_13 = arith.constant 0 : i32
    %69 = vector.broadcast %c0_i32_13 : i32 to vector<8x8x256xi32>
    %70 = arith.cmpi ne, %68, %69 : vector<8x8x256xi32>
    %71 = vector.extract_strided_slice %64 {offsets = [0, 0, 16], sizes = [8, 8, 240], strides = [1, 1, 1]} : vector<8x8x256xf32> to vector<8x8x240xf32>
    %72 = vector.extract_strided_slice %64 {offsets = [0, 0, 0], sizes = [8, 8, 16], strides = [1, 1, 1]} : vector<8x8x256xf32> to vector<8x8x16xf32>
    %73 = tpu.concatenate %71, %72 in 2 : vector<8x8x240xf32>, vector<8x8x16xf32> -> vector<8x8x256xf32>
    %74 = vector.extract_strided_slice %64 {offsets = [0, 0, 240], sizes = [8, 8, 16], strides = [1, 1, 1]} : vector<8x8x256xf32> to vector<8x8x16xf32>
    %75 = vector.extract_strided_slice %64 {offsets = [0, 0, 0], sizes = [8, 8, 240], strides = [1, 1, 1]} : vector<8x8x256xf32> to vector<8x8x240xf32>
    %76 = tpu.concatenate %74, %75 in 2 : vector<8x8x16xf32>, vector<8x8x240xf32> -> vector<8x8x256xf32>
    %c4_i32 = arith.constant 4 : i32
    %77 = vector.broadcast %c4_i32 : i32 to vector<8x8x256xi32>
    %78 = arith.shrsi %1, %77 : vector<8x8x256xi32>
    %c1_i32_14 = arith.constant 1 : i32
    %79 = vector.broadcast %c1_i32_14 : i32 to vector<8x8x256xi32>
    %80 = arith.andi %78, %79 : vector<8x8x256xi32>
    %c0_i32_15 = arith.constant 0 : i32
    %81 = vector.broadcast %c0_i32_15 : i32 to vector<8x8x256xi32>
    %82 = arith.cmpi eq, %80, %81 : vector<8x8x256xi32>
    %83 = arith.select %82, %73, %76 : vector<8x8x256xi1>, vector<8x8x256xf32>
    %84 = arith.select %70, %83, %64 : vector<8x8x256xi1>, vector<8x8x256xf32>
    %85 = vector.extract_strided_slice %84 {offsets = [0, 0, 32], sizes = [8, 8, 224], strides = [1, 1, 1]} : vector<8x8x256xf32> to vector<8x8x224xf32>
    %86 = vector.extract_strided_slice %84 {offsets = [0, 0, 0], sizes = [8, 8, 32], strides = [1, 1, 1]} : vector<8x8x256xf32> to vector<8x8x32xf32>
    %87 = tpu.concatenate %85, %86 in 2 : vector<8x8x224xf32>, vector<8x8x32xf32> -> vector<8x8x256xf32>
    %88 = vector.extract_strided_slice %84 {offsets = [0, 0, 224], sizes = [8, 8, 32], strides = [1, 1, 1]} : vector<8x8x256xf32> to vector<8x8x32xf32>
    %89 = vector.extract_strided_slice %84 {offsets = [0, 0, 0], sizes = [8, 8, 224], strides = [1, 1, 1]} : vector<8x8x256xf32> to vector<8x8x224xf32>
    %90 = tpu.concatenate %88, %89 in 2 : vector<8x8x32xf32>, vector<8x8x224xf32> -> vector<8x8x256xf32>
    %c5_i32 = arith.constant 5 : i32
    %91 = vector.broadcast %c5_i32 : i32 to vector<8x8x256xi32>
    %92 = arith.shrsi %1, %91 : vector<8x8x256xi32>
    %c1_i32_16 = arith.constant 1 : i32
    %93 = vector.broadcast %c1_i32_16 : i32 to vector<8x8x256xi32>
    %94 = arith.andi %92, %93 : vector<8x8x256xi32>
    %c0_i32_17 = arith.constant 0 : i32
    %95 = vector.broadcast %c0_i32_17 : i32 to vector<8x8x256xi32>
    %96 = arith.cmpi eq, %94, %95 : vector<8x8x256xi32>
    %97 = arith.select %96, %87, %90 : vector<8x8x256xi1>, vector<8x8x256xf32>
    %98 = arith.select %70, %97, %84 : vector<8x8x256xi1>, vector<8x8x256xf32>
    %99 = vector.extract_strided_slice %98 {offsets = [0, 0, 64], sizes = [8, 8, 192], strides = [1, 1, 1]} : vector<8x8x256xf32> to vector<8x8x192xf32>
    %100 = vector.extract_strided_slice %98 {offsets = [0, 0, 0], sizes = [8, 8, 64], strides = [1, 1, 1]} : vector<8x8x256xf32> to vector<8x8x64xf32>
    %101 = tpu.concatenate %99, %100 in 2 : vector<8x8x192xf32>, vector<8x8x64xf32> -> vector<8x8x256xf32>
    %102 = vector.extract_strided_slice %98 {offsets = [0, 0, 192], sizes = [8, 8, 64], strides = [1, 1, 1]} : vector<8x8x256xf32> to vector<8x8x64xf32>
    %103 = vector.extract_strided_slice %98 {offsets = [0, 0, 0], sizes = [8, 8, 192], strides = [1, 1, 1]} : vector<8x8x256xf32> to vector<8x8x192xf32>
    %104 = tpu.concatenate %102, %103 in 2 : vector<8x8x64xf32>, vector<8x8x192xf32> -> vector<8x8x256xf32>
    %c6_i32 = arith.constant 6 : i32
    %105 = vector.broadcast %c6_i32 : i32 to vector<8x8x256xi32>
    %106 = arith.shrsi %1, %105 : vector<8x8x256xi32>
    %c1_i32_18 = arith.constant 1 : i32
    %107 = vector.broadcast %c1_i32_18 : i32 to vector<8x8x256xi32>
    %108 = arith.andi %106, %107 : vector<8x8x256xi32>
    %c0_i32_19 = arith.constant 0 : i32
    %109 = vector.broadcast %c0_i32_19 : i32 to vector<8x8x256xi32>
    %110 = arith.cmpi eq, %108, %109 : vector<8x8x256xi32>
    %111 = arith.select %110, %101, %104 : vector<8x8x256xi1>, vector<8x8x256xf32>
    %112 = arith.select %70, %111, %98 : vector<8x8x256xi1>, vector<8x8x256xf32>
    %113 = vector.extract_strided_slice %112 {offsets = [0, 0, 128], sizes = [8, 8, 128], strides = [1, 1, 1]} : vector<8x8x256xf32> to vector<8x8x128xf32>
    %114 = vector.extract_strided_slice %112 {offsets = [0, 0, 0], sizes = [8, 8, 128], strides = [1, 1, 1]} : vector<8x8x256xf32> to vector<8x8x128xf32>
    %115 = tpu.concatenate %113, %114 in 2 : vector<8x8x128xf32>, vector<8x8x128xf32> -> vector<8x8x256xf32>
    %116 = vector.extract_strided_slice %112 {offsets = [0, 0, 128], sizes = [8, 8, 128], strides = [1, 1, 1]} : vector<8x8x256xf32> to vector<8x8x128xf32>
    %117 = vector.extract_strided_slice %112 {offsets = [0, 0, 0], sizes = [8, 8, 128], strides = [1, 1, 1]} : vector<8x8x256xf32> to vector<8x8x128xf32>
    %118 = tpu.concatenate %116, %117 in 2 : vector<8x8x128xf32>, vector<8x8x128xf32> -> vector<8x8x256xf32>
    %c7_i32 = arith.constant 7 : i32
    %119 = vector.broadcast %c7_i32 : i32 to vector<8x8x256xi32>
    %120 = arith.shrsi %1, %119 : vector<8x8x256xi32>
    %c1_i32_20 = arith.constant 1 : i32
    %121 = vector.broadcast %c1_i32_20 : i32 to vector<8x8x256xi32>
    %122 = arith.andi %120, %121 : vector<8x8x256xi32>
    %c0_i32_21 = arith.constant 0 : i32
    %123 = vector.broadcast %c0_i32_21 : i32 to vector<8x8x256xi32>
    %124 = arith.cmpi eq, %122, %123 : vector<8x8x256xi32>
    %125 = arith.select %124, %115, %118 : vector<8x8x256xi1>, vector<8x8x256xf32>
    %126 = arith.select %70, %125, %112 : vector<8x8x256xi1>, vector<8x8x256xf32>
    %c0_22 = arith.constant 0 : index
    %127 = memref.load %arg1[%c0_22] : memref<3xi32, #tpu.memory_space<smem>>
    %c0_i32_23 = arith.constant 0 : i32
    %128 = vector.broadcast %c0_i32_23 : i32 to vector<8x8x256xi32>
    %129 = vector.broadcast %127 : i32 to vector<8x8x256xi32>
    %130 = arith.addi %128, %129 : vector<8x8x256xi32>
    %c0_i32_24 = arith.constant 0 : i32
    %131 = vector.broadcast %c0_i32_24 : i32 to vector<8x8x256xi32>
    %132 = arith.cmpi ne, %130, %131 : vector<8x8x256xi32>
    %133 = vector.extract_strided_slice %126 {offsets = [0, 1, 0], sizes = [8, 7, 256], strides = [1, 1, 1]} : vector<8x8x256xf32> to vector<8x7x256xf32>
    %134 = vector.extract_strided_slice %126 {offsets = [0, 0, 0], sizes = [8, 1, 256], strides = [1, 1, 1]} : vector<8x8x256xf32> to vector<8x1x256xf32>
    %135 = tpu.concatenate %133, %134 in 1 : vector<8x7x256xf32>, vector<8x1x256xf32> -> vector<8x8x256xf32>
    %136 = vector.extract_strided_slice %126 {offsets = [0, 7, 0], sizes = [8, 1, 256], strides = [1, 1, 1]} : vector<8x8x256xf32> to vector<8x1x256xf32>
    %137 = vector.extract_strided_slice %126 {offsets = [0, 0, 0], sizes = [8, 7, 256], strides = [1, 1, 1]} : vector<8x8x256xf32> to vector<8x7x256xf32>
    %138 = tpu.concatenate %136, %137 in 1 : vector<8x1x256xf32>, vector<8x7x256xf32> -> vector<8x8x256xf32>
    %c0_i32_25 = arith.constant 0 : i32
    %139 = vector.broadcast %c0_i32_25 : i32 to vector<8x8x256xi32>
    %140 = arith.shrsi %2, %139 : vector<8x8x256xi32>
    %c1_i32_26 = arith.constant 1 : i32
    %141 = vector.broadcast %c1_i32_26 : i32 to vector<8x8x256xi32>
    %142 = arith.andi %140, %141 : vector<8x8x256xi32>
    %c0_i32_27 = arith.constant 0 : i32
    %143 = vector.broadcast %c0_i32_27 : i32 to vector<8x8x256xi32>
    %144 = arith.cmpi eq, %142, %143 : vector<8x8x256xi32>
    %145 = arith.select %144, %135, %138 : vector<8x8x256xi1>, vector<8x8x256xf32>
    %146 = arith.select %132, %145, %126 : vector<8x8x256xi1>, vector<8x8x256xf32>
    %147 = vector.extract_strided_slice %146 {offsets = [0, 2, 0], sizes = [8, 6, 256], strides = [1, 1, 1]} : vector<8x8x256xf32> to vector<8x6x256xf32>
    %148 = vector.extract_strided_slice %146 {offsets = [0, 0, 0], sizes = [8, 2, 256], strides = [1, 1, 1]} : vector<8x8x256xf32> to vector<8x2x256xf32>
    %149 = tpu.concatenate %147, %148 in 1 : vector<8x6x256xf32>, vector<8x2x256xf32> -> vector<8x8x256xf32>
    %150 = vector.extract_strided_slice %146 {offsets = [0, 6, 0], sizes = [8, 2, 256], strides = [1, 1, 1]} : vector<8x8x256xf32> to vector<8x2x256xf32>
    %151 = vector.extract_strided_slice %146 {offsets = [0, 0, 0], sizes = [8, 6, 256], strides = [1, 1, 1]} : vector<8x8x256xf32> to vector<8x6x256xf32>
    %152 = tpu.concatenate %150, %151 in 1 : vector<8x2x256xf32>, vector<8x6x256xf32> -> vector<8x8x256xf32>
    %c1_i32_28 = arith.constant 1 : i32
    %153 = vector.broadcast %c1_i32_28 : i32 to vector<8x8x256xi32>
    %154 = arith.shrsi %2, %153 : vector<8x8x256xi32>
    %c1_i32_29 = arith.constant 1 : i32
    %155 = vector.broadcast %c1_i32_29 : i32 to vector<8x8x256xi32>
    %156 = arith.andi %154, %155 : vector<8x8x256xi32>
    %c0_i32_30 = arith.constant 0 : i32
    %157 = vector.broadcast %c0_i32_30 : i32 to vector<8x8x256xi32>
    %158 = arith.cmpi eq, %156, %157 : vector<8x8x256xi32>
    %159 = arith.select %158, %149, %152 : vector<8x8x256xi1>, vector<8x8x256xf32>
    %160 = arith.select %132, %159, %146 : vector<8x8x256xi1>, vector<8x8x256xf32>
    %161 = vector.extract_strided_slice %160 {offsets = [0, 4, 0], sizes = [8, 4, 256], strides = [1, 1, 1]} : vector<8x8x256xf32> to vector<8x4x256xf32>
    %162 = vector.extract_strided_slice %160 {offsets = [0, 0, 0], sizes = [8, 4, 256], strides = [1, 1, 1]} : vector<8x8x256xf32> to vector<8x4x256xf32>
    %163 = tpu.concatenate %161, %162 in 1 : vector<8x4x256xf32>, vector<8x4x256xf32> -> vector<8x8x256xf32>
    %164 = vector.extract_strided_slice %160 {offsets = [0, 4, 0], sizes = [8, 4, 256], strides = [1, 1, 1]} : vector<8x8x256xf32> to vector<8x4x256xf32>
    %165 = vector.extract_strided_slice %160 {offsets = [0, 0, 0], sizes = [8, 4, 256], strides = [1, 1, 1]} : vector<8x8x256xf32> to vector<8x4x256xf32>
    %166 = tpu.concatenate %164, %165 in 1 : vector<8x4x256xf32>, vector<8x4x256xf32> -> vector<8x8x256xf32>
    %c2_i32_31 = arith.constant 2 : i32
    %167 = vector.broadcast %c2_i32_31 : i32 to vector<8x8x256xi32>
    %168 = arith.shrsi %2, %167 : vector<8x8x256xi32>
    %c1_i32_32 = arith.constant 1 : i32
    %169 = vector.broadcast %c1_i32_32 : i32 to vector<8x8x256xi32>
    %170 = arith.andi %168, %169 : vector<8x8x256xi32>
    %c0_i32_33 = arith.constant 0 : i32
    %171 = vector.broadcast %c0_i32_33 : i32 to vector<8x8x256xi32>
    %172 = arith.cmpi eq, %170, %171 : vector<8x8x256xi32>
    %173 = arith.select %172, %163, %166 : vector<8x8x256xi1>, vector<8x8x256xf32>
    %174 = arith.select %132, %173, %160 : vector<8x8x256xi1>, vector<8x8x256xf32>
    %c0_34 = arith.constant 0 : index
    %c0_35 = arith.constant 0 : index
    %c0_36 = arith.constant 0 : index
    %175 = vector.load %arg3[%c0_34, %c0_35, %c0_36] : memref<8x8x256xf32, #tpu.memory_space<vmem>>, vector<8x8x256xf32>
    tpu.vector_store %arg3[%c0_34, %c0_35, %c0_36], %174 {strides = array<i32>} : memref<8x8x256xf32, #tpu.memory_space<vmem>>, vector<8x8x256xf32>,
    return
  }
  func.func @transform_0(%arg0: i32, %arg1: memref<3xi32, #tpu.memory_space<smem>>) -> (i32, i32, i32) {
    %c0_i32 = arith.constant 0 : i32
    %c0_i32_0 = arith.constant 0 : i32
    %c0_i32_1 = arith.constant 0 : i32
    return %arg0, %c0_i32, %c0_i32_0 : i32, i32, i32
  }
  func.func @transform_1(%arg0: i32, %arg1: memref<3xi32, #tpu.memory_space<smem>>) -> (i32, i32, i32) {
    %c0_i32 = arith.constant 0 : i32
    %c0_i32_0 = arith.constant 0 : i32
    %c0_i32_1 = arith.constant 0 : i32
    return %arg0, %c0_i32, %c0_i32_0 : i32, i32, i32
  }
}

</mosaic_0001>

<bundles_post_ra>
// kernel: tpu_custom_call.1
= control target key start
LH: loop header
LB: loop body
LE: loop exit
PB: predicated region body
PF: predicated region fallthrough
CT: control target
= control target key end

     0   :  { %s3631_s0 = inlined_call_operand.hbm [shape: s32[3], index: 0, kind: input, shape index: {}]   ;;  %s3632_s1 = inlined_call_operand.hbm [shape: f32[8,8,256], index: 1, kind: input, shape index: {}]   ;;  %s3633_s2 = inlined_call_operand.hbm [shape: f32[8,8,256], index: 2, kind: output, shape index: {}]  }
   0x1   :  { %s1843_s11 = scalar_lea.hbm %s3631_s0, 16 }
   0x2   :  { %p1844_p0 = scmp.ne.s32.totalorder %s3631_s0, %s1843_s11  ;;  %p1847_p1 = scmp.lt.u32.totalorder %s1843_s11, %s3631_s0 }
   0x4   :  { %p1849_p2 = pnand %p1847_p1, %p1844_p0 }
   0x6   :  { %1852 = shalt.err (!%p1849_p2)  }
   0x7   :  { %s1903_s16 = smov [#allocation3]  }
   0x8   :  { %8 = dma.hbm_to_smem %s3631_s0, 16, %s1903_s16, [#allocation2] }
   0x9   :  { %1897 = dma.done.wait [#allocation2], 16 }
   0xa   :  { %1898 = vsyncadd [#allocation2], 4294967280 }
   0xb   :  { %10 = sfence }
   0xc   :  { %11 = vsyncpa [#allocation5], 0 }
   0xd   :  { %12 = vsyncpa [#allocation6], 0  ;;  %s1904_s19 = smov [#allocation4]   ;;  %s1853_s23 = scalar_lea.hbm %s3632_s1, 2048 }
   0xe   :  { %s18_s20 = sshll.u32 %s1904_s19, 4  ;;  %p1854_p3 = scmp.ne.s32.totalorder %s3632_s1, %s1853_s23  ;;  %s19_s20 = int_to_ptr.vmem [resolvable:$true] %s18_s20 }
   0xf   :  { %p1857_p4 = scmp.lt.u32.totalorder %s1853_s23, %s3632_s1 }
  0x11   :  { %p1859_p5 = pnand %p1857_p4, %p1854_p3 }
  0x13   :  { %1862 = shalt.err (!%p1859_p5)
}
  0x14   :  { %s1863_s0 = scalar_lea.vmem %s19_s20, 2048  ;;  %p1868_p7 = scmp.lt.s32.totalorder %s19_s20, %s19_s20 }
  0x15   :  { %p1864_p6 = scmp.ne.s32.totalorder %s19_s20, %s1863_s0  ;;  %p1869_p8 = scmp.lt.s32.totalorder %s1863_s0, %s1863_s0 }
  0x17   :  { %p1870_p9 = por %p1869_p8, %p1868_p7 }
  0x19   :  { %p1871_p10 = pnand %p1870_p9, %p1864_p6 }
  0x1b   :  { %1874 = shalt.err (!%p1871_p10)
}
  0x1c   :  { %s1905_s28 = smov 256   ;;  %s1906_s29 = smov 16  }
  0x1d   :  { %24 = dma.hbm_to_vmem [thread:$0]  %s3632_s1, 2048, %s19_s20, [#allocation5], %s1905_s28, %s1905_s28, %s1906_s29  }
  0x1e   :  { %1899 = dma.done.wait [#allocation5], 2048  }
  0x1f   :  { %1900 = vsyncadd [#allocation5], 4294965248  ;;  %v1962_v0 = vld [vmem:[#allocation4 + $0x10] sm:$0xff]  ;;  %v1964_v1 = vld [vmem:[#allocation4] sm:$0xff]  ;;  %s1907_s4 = smov 127   ;;  %s1908_s1 = smov 1   ;;  %v44_v32 = vlaneseq }
  0x20   :  { %72 = vrot.lane.b32.xlu1 %v1962_v0, %s1907_s4  ;;  %68 = vrot.lane.b32.xlu0 %v1964_v1, %s1907_s4  ;;  %v1968_v2 = vld [vmem:[#allocation4 + $0x18] sm:$0xff]  ;;  %v1970_v3 = vld [vmem:[#allocation4 + $0x8] sm:$0xff]  ;;  %v1976_v5 = vld [vmem:[#allocation4 + $0x20] sm:$0xff]  ;;  %s1810_s5 = sld [smem:[#allocation3 + $0x2]]  ;;  %vm100_vm0 = vcmask 1039360   ;;  %vm181_vm1 = vcmask 7168  }
  0x21   :  { %v1974_v4 = vld [vmem:[#allocation4 + $0x28] sm:$0xff]  ;;  %v1980_v6 = vld [vmem:[#allocation4 + $0x38] sm:$0xff]  ;;  %v1982_v7 = vld [vmem:[#allocation4 + $0x30] sm:$0xff]  ;;  %v2047_v35 = vand.u32 127, %v44_v32  ;;  %s1909_s6 = smov 126   ;;  %s1910_s7 = smov 2  }
  0x22   :  { %v1986_v8 = vld [vmem:[#allocation4 + $0x48] sm:$0xff]  ;;  %v1988_v9 = vld [vmem:[#allocation4 + $0x40] sm:$0xff]  ;;  %v1992_v10 = vld [vmem:[#allocation4 + $0x58] sm:$0xff]  ;;  %vm298_vm5 = vcmask 1031168   ;;  %vm379_vm6 = vcmask 15360   ;;  %s1911_s8 = smov 124  }
  0x23   :  { %v1994_v11 = vld [vmem:[#allocation4 + $0x50] sm:$0xff]  ;;  %v1998_v12 = vld [vmem:[#allocation4 + $0x68] sm:$0xff]  ;;  %v2000_v13 = vld [vmem:[#allocation4 + $0x60] sm:$0xff]  ;;  %v2050_v38 = vadd.s32 128, %v2047_v35  ;;  %v214_v41 = vand.u32 1, %v2047_v35  ;;  %s1912_s9 = smov 4  }
  0x24   :  { %74 = vrot.lane.b32.xlu1 %v1968_v2, %s1907_s4  ;;  %70 = vrot.lane.b32.xlu0 %v1970_v3, %s1907_s4  ;;  %v2004_v14 = vld [vmem:[#allocation4 + $0x78] sm:$0xff]  ;;  %v2006_v15 = vld [vmem:[#allocation4 + $0x70] sm:$0xff]  ;;  %vm498_vm9 = vcmask 1014784   ;;  %vm579_vm10 = vcmask 31744   ;;  %s1913_s10 = smov 120   ;;  %s1914_s11 = smov 8  }
  0x25   :  { %v215_v42 = vand.u32 1, %v2050_v38  ;;  %vm2060_vm2 = vcmp.eq.s32.totalorder %v214_v41, 0  ;;  %vm698_vm13 = vcmask 982016   ;;  %vm779_vm14 = vcmask 64512   ;;  %s1915_s12 = smov 112   ;;  %s1811_s13 = sld [smem:[#allocation3 + $0x1]] }
  0x26   :  { %v50_v45 = vstv %s1810_s5  ;;  %s1916_s14 = smov 96   ;;  %s1917_s15 = smov 32  }
  0x27   :  { %vm2064_vm3 = vcmp.eq.s32.totalorder %v215_v42, 0  ;;  %vm2068_vm4 = vcmp.ne.s32.totalorder %v50_v45, 0  ;;  %s1918_s16 = smov 64   ;;  %s1396_s17 = sld [smem:[#allocation3]] }
  0x28   :  { %78 = vrot.lane.b32.xlu1 %v1974_v4, %s1907_s4  ;;  %76 = vrot.lane.b32.xlu0 %v1976_v5, %s1907_s4  ;;  %s1919_s18 = smov [#allocation7]  }
  0x29   :  { %s1798_s19 = sshll.u32 %s1919_s18, 4  ;;  %s1799_s19 = int_to_ptr.vmem [resolvable:$true] %s1798_s19 }
  0x2a   :  { %s1875_s20 = scalar_lea.vmem %s1799_s19, 2048  ;;  %p1880_p12 = scmp.lt.s32.totalorder %s1799_s19, %s1799_s19 }
  0x2b   :  { %p1876_p11 = scmp.ne.s32.totalorder %s1799_s19, %s1875_s20  ;;  %p1881_p13 = scmp.lt.s32.totalorder %s1875_s20, %s1875_s20 }
  0x2c   :  { %82 = vrot.lane.b32.xlu1 %v1980_v6, %s1907_s4  ;;  %80 = vrot.lane.b32.xlu0 %v1982_v7, %s1907_s4 }
  0x2d   :  { %p1882_p0 = por %p1881_p13, %p1880_p12 }
  0x2f   :  { %p1883_p1 = pnand %p1882_p0, %p1876_p11 }
  0x30   :  { %86 = vrot.lane.b32.xlu1 %v1986_v8, %s1907_s4  ;;  %84 = vrot.lane.b32.xlu0 %v1988_v9, %s1907_s4 }
  0x34   :  { %90 = vrot.lane.b32.xlu1 %v1992_v10, %s1907_s4  ;;  %88 = vrot.lane.b32.xlu0 %v1994_v11, %s1907_s4 }
  0x38   :  { %94 = vrot.lane.b32.xlu1 %v1998_v12, %s1907_s4  ;;  %92 = vrot.lane.b32.xlu0 %v2000_v13, %s1907_s4 }
  0x3c   :  { %98 = vrot.lane.b32.xlu1 %v2004_v14, %s1907_s4  ;;  %96 = vrot.lane.b32.xlu0 %v2006_v15, %s1907_s4 }
  0x40   :  { %143 = vrot.lane.b32.xlu1 %v1968_v2, %s1908_s1  ;;  %141 = vrot.lane.b32.xlu0 %v1970_v3, %s1908_s1 }
  0x44   :  { %147 = vrot.lane.b32.xlu1 %v1980_v6, %s1908_s1  ;;  %145 = vrot.lane.b32.xlu0 %v1974_v4, %s1908_s1 }
  0x48   :  { %151 = vrot.lane.b32.xlu1 %v1992_v10, %s1908_s1  ;;  %149 = vrot.lane.b32.xlu0 %v1986_v8, %s1908_s1 }
  0x4c   :  { %155 = vrot.lane.b32.xlu1 %v2004_v14, %s1908_s1  ;;  %153 = vrot.lane.b32.xlu0 %v1998_v12, %s1908_s1 }
  0x50   :  { %167 = vrot.lane.b32.xlu1 %v1962_v0, %s1908_s1  ;;  %165 = vrot.lane.b32.xlu0 %v1964_v1, %s1908_s1 }
  0x54   :  { %171 = vrot.lane.b32.xlu1 %v1982_v7, %s1908_s1  ;;  %169 = vrot.lane.b32.xlu0 %v1976_v5, %s1908_s1 }
  0x58   :  { %175 = vrot.lane.b32.xlu1 %v1994_v11, %s1908_s1  ;;  %173 = vrot.lane.b32.xlu0 %v1988_v9, %s1908_s1 }
  0x5c   :  { %179 = vrot.lane.b32.xlu1 %v2006_v15, %s1908_s1  ;;  %177 = vrot.lane.b32.xlu0 %v2000_v13, %s1908_s1 }
  0x92   :  { %v73_v16 = vpop.permute.xlu1 %72  ;;  %v69_v17 = vpop.permute.xlu0 %68 }
  0x96   :  { %v75_v18 = vpop.permute.xlu1 %74  ;;  %v71_v19 = vpop.permute.xlu0 %70 }
  0x97   :  { %v101_v49 = vsel %vm100_vm0, %v69_v17, %v71_v19  ;;  %v133_v50 = vsel %vm100_vm0, %v71_v19, %v69_v17  ;;  %v102_v59 = vsel %vm100_vm0, %v73_v16, %v75_v18  ;;  %v134_v60 = vsel %vm100_vm0, %v75_v18, %v73_v16 }
  0x9a   :  { %v79_v20 = vpop.permute.xlu1 %78  ;;  %v77_v21 = vpop.permute.xlu0 %76 }
  0x9b   :  { %v135_v41 = vsel %vm100_vm0, %v79_v20, %v77_v21 }
  0x9e   :  { %v2026_v22 = vpop.permute.xlu1 %82  ;;  %v2028_v23 = vpop.permute.xlu0 %80 }
  0xa2   :  { %v2030_v24 = vpop.permute.xlu1 %86  ;;  %v2032_v25 = vpop.permute.xlu0 %84 }
  0xa6   :  { %v2034_v26 = vpop.permute.xlu1 %90  ;;  %v2036_v27 = vpop.permute.xlu0 %88 }
  0xaa   :  { %v2038_v28 = vpop.permute.xlu1 %94  ;;  %v2040_v29 = vpop.permute.xlu0 %92 }
  0xae   :  { %v2042_v30 = vpop.permute.xlu1 %98  ;;  %v2044_v31 = vpop.permute.xlu0 %96 }
  0xb2   :  { %v144_v33 = vpop.permute.xlu1 %143  ;;  %v142_v34 = vpop.permute.xlu0 %141 }
  0xb6   :  { %v148_v36 = vpop.permute.xlu1 %147  ;;  %v146_v37 = vpop.permute.xlu0 %145 }
  0xba   :  { %v2052_v39 = vpop.permute.xlu1 %151  ;;  %v150_v40 = vpop.permute.xlu0 %149 }
  0xbe   :  { %v2056_v43 = vpop.permute.xlu1 %155  ;;  %v2058_v44 = vpop.permute.xlu0 %153 }
  0xc2   :  { %v168_v51 = vpop.permute.xlu1 %167  ;;  %v166_v52 = vpop.permute.xlu0 %165 }
  0xc3   :  { %v183_v53 = vsel %vm181_vm1, %v168_v51, %v144_v33  ;;  %v207_v54 = vsel %vm181_vm1, %v144_v33, %v168_v51  ;;  %v182_v55 = vsel %vm181_vm1, %v166_v52, %v142_v34  ;;  %v206_v56 = vsel %vm181_vm1, %v142_v34, %v166_v52 }
  0xc4   :  { %v218_v57 = vsel %vm2060_vm2, %v101_v49, %v206_v56  ;;  %v219_v58 = vsel %vm2064_vm3, %v133_v50, %v182_v55  ;;  %v220_v16 = vsel %vm2060_vm2, %v102_v59, %v207_v54  ;;  %v221_v17 = vsel %vm2064_vm3, %v134_v60, %v183_v53 }
  0xc5   :  { %v2087_v61 = vsel %vm2068_vm4, %v218_v57, %v1964_v1  ;;  %v2092_v62 = vsel %vm2068_vm4, %v219_v58, %v1970_v3  ;;  %v103_v34 = vsel %vm100_vm0, %v77_v21, %v79_v20  ;;  %v2109_v42 = vsel %vm2068_vm4, %v220_v16, %v1962_v0 }
  0xc6   :  { %266 = vrot.lane.b32.xlu0 %v2087_v61, %s1909_s6  ;;  %268 = vrot.lane.b32.xlu1 %v2092_v62, %s1909_s6  ;;  %v170_v63 = vpop.permute.xlu0 %169  ;;  %v172_v33 = vpop.permute.xlu1 %171  ;;  %v2114_v45 = vsel %vm2068_vm4, %v221_v17, %v1968_v2  ;;  %v104_v51 = vsel %vm100_vm0, %v2028_v23, %v2026_v22  ;;  %v136_v52 = vsel %vm100_vm0, %v2026_v22, %v2028_v23 }
  0xc7   :  { %v184_v18 = vsel %vm181_vm1, %v170_v63, %v146_v37  ;;  %v208_v19 = vsel %vm181_vm1, %v146_v37, %v170_v63  ;;  %v185_v21 = vsel %vm181_vm1, %v172_v33, %v148_v36  ;;  %v209_v49 = vsel %vm181_vm1, %v148_v36, %v172_v33 }
  0xc8   :  { %v222_v37 = vsel %vm2060_vm2, %v103_v34, %v208_v19  ;;  %v223_v20 = vsel %vm2064_vm3, %v135_v41, %v184_v18  ;;  %v224_v36 = vsel %vm2060_vm2, %v104_v51, %v209_v49  ;;  %v225_v22 = vsel %vm2064_vm3, %v136_v52, %v185_v21 }
  0xc9   :  { %v2135_v53 = vsel %vm2068_vm4, %v222_v37, %v1976_v5  ;;  %v239_v54 = vsel %vm2068_vm4, %v223_v20, %v1974_v4  ;;  %v105_v57 = vsel %vm100_vm0, %v2032_v25, %v2030_v24  ;;  %v137_v58 = vsel %vm100_vm0, %v2030_v24, %v2032_v25 }
  0xca   :  { %270 = vrot.lane.b32.xlu0 %v2109_v42, %s1909_s6  ;;  %272 = vrot.lane.b32.xlu1 %v2114_v45, %s1909_s6  ;;  %v174_v50 = vpop.permute.xlu0 %173  ;;  %v176_v56 = vpop.permute.xlu1 %175  ;;  %v240_v59 = vsel %vm2068_vm4, %v224_v36, %v1982_v7  ;;  %v241_v60 = vsel %vm2068_vm4, %v225_v22, %v1980_v6  ;;  %v106_v17 = vsel %vm100_vm0, %v2036_v27, %v2034_v26 }
  0xcb   :  { %v186_v23 = vsel %vm181_vm1, %v174_v50, %v150_v40  ;;  %v210_v55 = vsel %vm181_vm1, %v150_v40, %v174_v50  ;;  %v187_v24 = vsel %vm181_vm1, %v176_v56, %v2052_v39  ;;  %v211_v25 = vsel %vm181_vm1, %v2052_v39, %v176_v56 }
  0xcc   :  { %v226_v40 = vsel %vm2060_vm2, %v105_v57, %v210_v55  ;;  %v227_v63 = vsel %vm2064_vm3, %v137_v58, %v186_v23  ;;  %v138_v18 = vsel %vm100_vm0, %v2034_v26, %v2036_v27  ;;  %v228_v39 = vsel %vm2060_vm2, %v106_v17, %v211_v25 }
  0xcd   :  { %v242_v19 = vsel %vm2068_vm4, %v226_v40, %v1988_v9  ;;  %v243_v33 = vsel %vm2068_vm4, %v227_v63, %v1986_v8  ;;  %v229_v34 = vsel %vm2064_vm3, %v138_v18, %v187_v24  ;;  %v107_v37 = vsel %vm100_vm0, %v2040_v29, %v2038_v28 }
  0xce   :  { %274 = vrot.lane.b32.xlu0 %v2135_v53, %s1909_s6  ;;  %276 = vrot.lane.b32.xlu1 %v239_v54, %s1909_s6  ;;  %v178_v16 = vpop.permute.xlu0 %177  ;;  %v180_v41 = vpop.permute.xlu1 %179  ;;  %v139_v20 = vsel %vm100_vm0, %v2038_v28, %v2040_v29  ;;  %v244_v21 = vsel %vm2068_vm4, %v228_v39, %v1994_v11  ;;  %v245_v49 = vsel %vm2068_vm4, %v229_v34, %v1992_v10  ;;  %v412_v18 = vshra.s32 %v2047_v35, 1 }
  0xcf   :  { %v188_v26 = vsel %vm181_vm1, %v178_v16, %v2058_v44  ;;  %v212_v27 = vsel %vm181_vm1, %v2058_v44, %v178_v16  ;;  %v189_v28 = vsel %vm181_vm1, %v180_v41, %v2056_v43  ;;  %v213_v29 = vsel %vm181_vm1, %v2056_v43, %v180_v41 }
  0xd0   :  { %v230_v44 = vsel %vm2060_vm2, %v107_v37, %v212_v27  ;;  %v231_v50 = vsel %vm2064_vm3, %v139_v20, %v188_v26  ;;  %v108_v51 = vsel %vm100_vm0, %v2044_v31, %v2042_v30  ;;  %v140_v52 = vsel %vm100_vm0, %v2042_v30, %v2044_v31 }
  0xd1   :  { %v246_v36 = vsel %vm2068_vm4, %v230_v44, %v2000_v13  ;;  %v247_v22 = vsel %vm2068_vm4, %v231_v50, %v1998_v12  ;;  %v232_v43 = vsel %vm2060_vm2, %v108_v51, %v213_v29  ;;  %v233_v23 = vsel %vm2064_vm3, %v140_v52, %v189_v28 }
  0xd2   :  { %278 = vrot.lane.b32.xlu0 %v240_v59, %s1909_s6  ;;  %280 = vrot.lane.b32.xlu1 %v241_v60, %s1909_s6  ;;  %v248_v30 = vsel %vm2068_vm4, %v232_v43, %v2006_v15  ;;  %v249_v31 = vsel %vm2068_vm4, %v233_v23, %v2004_v14  ;;  %v2266_v34 = vand.u32 1, %v412_v18  ;;  %vm901_vm1 = vcmask 916480  }
  0xd3   :  { %vm982_vm2 = vcmask 130048  }
  0xd4   :  { %vm416_vm7 = vcmp.eq.s32.totalorder %v2266_v34, 0 }
  0xd6   :  { %282 = vrot.lane.b32.xlu0 %v242_v19, %s1909_s6  ;;  %284 = vrot.lane.b32.xlu1 %v243_v33, %s1909_s6 }
  0xda   :  { %286 = vrot.lane.b32.xlu0 %v244_v21, %s1909_s6  ;;  %288 = vrot.lane.b32.xlu1 %v245_v49, %s1909_s6 }
  0xde   :  { %290 = vrot.lane.b32.xlu0 %v246_v36, %s1909_s6  ;;  %292 = vrot.lane.b32.xlu1 %v247_v22, %s1909_s6 }
  0xe2   :  { %294 = vrot.lane.b32.xlu0 %v248_v30, %s1909_s6  ;;  %296 = vrot.lane.b32.xlu1 %v249_v31, %s1909_s6 }
  0xe6   :  { %339 = vrot.lane.b32.xlu0 %v2092_v62, %s1910_s7  ;;  %341 = vrot.lane.b32.xlu1 %v2114_v45, %s1910_s7 }
  0xea   :  { %343 = vrot.lane.b32.xlu0 %v239_v54, %s1910_s7  ;;  %345 = vrot.lane.b32.xlu1 %v241_v60, %s1910_s7 }
  0xee   :  { %347 = vrot.lane.b32.xlu0 %v243_v33, %s1910_s7  ;;  %349 = vrot.lane.b32.xlu1 %v245_v49, %s1910_s7 }
  0xf2   :  { %351 = vrot.lane.b32.xlu0 %v247_v22, %s1910_s7  ;;  %353 = vrot.lane.b32.xlu1 %v249_v31, %s1910_s7 }
  0xf6   :  { %363 = vrot.lane.b32.xlu0 %v2087_v61, %s1910_s7  ;;  %365 = vrot.lane.b32.xlu1 %v2109_v42, %s1910_s7 }
  0xfa   :  { %367 = vrot.lane.b32.xlu0 %v2135_v53, %s1910_s7  ;;  %369 = vrot.lane.b32.xlu1 %v240_v59, %s1910_s7 }
  0xfe   :  { %371 = vrot.lane.b32.xlu0 %v242_v19, %s1910_s7  ;;  %373 = vrot.lane.b32.xlu1 %v244_v21, %s1910_s7  ;;  %v413_v19 = vshra.s32 %v2050_v38, 1 }
 0x100   :  { %v2268_v26 = vand.u32 1, %v413_v19 }
 0x102   :  { %375 = vrot.lane.b32.xlu0 %v246_v36, %s1910_s7  ;;  %377 = vrot.lane.b32.xlu1 %v248_v30, %s1910_s7  ;;  %vm417_vm8 = vcmp.eq.s32.totalorder %v2268_v26, 0 }
 0x138   :  { %v269_v46 = vpop.permute.xlu1 %268  ;;  %v267_v47 = vpop.permute.xlu0 %266 }
 0x139   :  { %v299_v37 = vsel %vm298_vm5, %v267_v47, %v269_v46  ;;  %v331_v20 = vsel %vm298_vm5, %v269_v46, %v267_v47 }
 0x13c   :  { %v273_v62 = vpop.permute.xlu1 %272  ;;  %v271_v45 = vpop.permute.xlu0 %270 }
 0x13d   :  { %v300_v36 = vsel %vm298_vm5, %v271_v45, %v273_v62  ;;  %v332_v22 = vsel %vm298_vm5, %v273_v62, %v271_v45 }
 0x140   :  { %v277_v54 = vpop.permute.xlu1 %276  ;;  %v275_v55 = vpop.permute.xlu0 %274 }
 0x144   :  { %v281_v56 = vpop.permute.xlu1 %280  ;;  %v279_v57 = vpop.permute.xlu0 %278 }
 0x148   :  { %v2246_v58 = vpop.permute.xlu1 %284  ;;  %v2248_v61 = vpop.permute.xlu0 %282 }
 0x14c   :  { %v2250_v42 = vpop.permute.xlu1 %288  ;;  %v2252_v53 = vpop.permute.xlu0 %286 }
 0x150   :  { %v2254_v59 = vpop.permute.xlu1 %292  ;;  %v2256_v60 = vpop.permute.xlu0 %290 }
 0x154   :  { %v2258_v40 = vpop.permute.xlu1 %296  ;;  %v2260_v63 = vpop.permute.xlu0 %294 }
 0x158   :  { %v342_v24 = vpop.permute.xlu1 %341  ;;  %v340_v25 = vpop.permute.xlu0 %339 }
 0x15c   :  { %v346_v16 = vpop.permute.xlu1 %345  ;;  %v344_v17 = vpop.permute.xlu0 %343 }
 0x160   :  { %v2264_v33 = vpop.permute.xlu1 %349  ;;  %v348_v39 = vpop.permute.xlu0 %347 }
 0x164   :  { %v2270_v27 = vpop.permute.xlu1 %353  ;;  %v2272_v41 = vpop.permute.xlu0 %351 }
 0x168   :  { %v366_v21 = vpop.permute.xlu1 %365  ;;  %v364_v49 = vpop.permute.xlu0 %363 }
 0x169   :  { %v381_v44 = vsel %vm379_vm6, %v366_v21, %v342_v24  ;;  %v405_v50 = vsel %vm379_vm6, %v342_v24, %v366_v21  ;;  %v380_v28 = vsel %vm379_vm6, %v364_v49, %v340_v25  ;;  %v404_v29 = vsel %vm379_vm6, %v340_v25, %v364_v49 }
 0x16a   :  { %v418_v51 = vsel %vm416_vm7, %v299_v37, %v404_v29  ;;  %v419_v52 = vsel %vm417_vm8, %v331_v20, %v380_v28  ;;  %v420_v31 = vsel %vm416_vm7, %v300_v36, %v405_v50  ;;  %v421_v46 = vsel %vm417_vm8, %v332_v22, %v381_v44 }
 0x16b   :  { %v2291_v43 = vsel %vm2068_vm4, %v418_v51, %v1964_v1  ;;  %v2296_v23 = vsel %vm2068_vm4, %v419_v52, %v1970_v3  ;;  %v301_v24 = vsel %vm298_vm5, %v275_v55, %v277_v54  ;;  %v333_v25 = vsel %vm298_vm5, %v277_v54, %v275_v55 }
 0x16c   :  { %466 = vrot.lane.b32.xlu0 %v2291_v43, %s1911_s8  ;;  %468 = vrot.lane.b32.xlu1 %v2296_v23, %s1911_s8  ;;  %v368_v30 = vpop.permute.xlu0 %367  ;;  %v370_v45 = vpop.permute.xlu1 %369  ;;  %v2313_v18 = vsel %vm2068_vm4, %v420_v31, %v1962_v0  ;;  %v2318_v19 = vsel %vm2068_vm4, %v421_v46, %v1968_v2  ;;  %v302_v21 = vsel %vm298_vm5, %v279_v57, %v281_v56 }
 0x16d   :  { %v382_v47 = vsel %vm379_vm6, %v368_v30, %v344_v17  ;;  %v406_v62 = vsel %vm379_vm6, %v344_v17, %v368_v30  ;;  %v383_v55 = vsel %vm379_vm6, %v370_v45, %v346_v16  ;;  %v407_v37 = vsel %vm379_vm6, %v346_v16, %v370_v45 }
 0x16e   :  { %v422_v17 = vsel %vm416_vm7, %v301_v24, %v406_v62  ;;  %v423_v54 = vsel %vm417_vm8, %v333_v25, %v382_v47  ;;  %v334_v49 = vsel %vm298_vm5, %v281_v56, %v279_v57  ;;  %v424_v16 = vsel %vm416_vm7, %v302_v21, %v407_v37 }
 0x16f   :  { %v2335_v44 = vsel %vm2068_vm4, %v422_v17, %v1976_v5  ;;  %v439_v50 = vsel %vm2068_vm4, %v423_v54, %v1974_v4  ;;  %v425_v56 = vsel %vm417_vm8, %v334_v49, %v383_v55  ;;  %v303_v51 = vsel %vm298_vm5, %v2248_v61, %v2246_v58 }
 0x170   :  { %470 = vrot.lane.b32.xlu0 %v2313_v18, %s1911_s8  ;;  %472 = vrot.lane.b32.xlu1 %v2318_v19, %s1911_s8  ;;  %v372_v20 = vpop.permute.xlu0 %371  ;;  %v374_v29 = vpop.permute.xlu1 %373  ;;  %v335_v52 = vsel %vm298_vm5, %v2246_v58, %v2248_v61  ;;  %v440_v36 = vsel %vm2068_vm4, %v424_v16, %v1982_v7  ;;  %v441_v22 = vsel %vm2068_vm4, %v425_v56, %v1980_v6 }
 0x171   :  { %v384_v57 = vsel %vm379_vm6, %v372_v20, %v348_v39  ;;  %v408_v28 = vsel %vm379_vm6, %v348_v39, %v372_v20  ;;  %v385_v58 = vsel %vm379_vm6, %v374_v29, %v2264_v33  ;;  %v409_v61 = vsel %vm379_vm6, %v2264_v33, %v374_v29 }
 0x172   :  { %v426_v39 = vsel %vm416_vm7, %v303_v51, %v408_v28  ;;  %v427_v30 = vsel %vm417_vm8, %v335_v52, %v384_v57  ;;  %v304_v46 = vsel %vm298_vm5, %v2252_v53, %v2250_v42  ;;  %v336_v47 = vsel %vm298_vm5, %v2250_v42, %v2252_v53 }
 0x173   :  { %v442_v62 = vsel %vm2068_vm4, %v426_v39, %v1988_v9  ;;  %v443_v45 = vsel %vm2068_vm4, %v427_v30, %v1986_v8  ;;  %v428_v33 = vsel %vm416_vm7, %v304_v46, %v409_v61  ;;  %v429_v24 = vsel %vm417_vm8, %v336_v47, %v385_v58 }
 0x174   :  { %474 = vrot.lane.b32.xlu0 %v2335_v44, %s1911_s8  ;;  %476 = vrot.lane.b32.xlu1 %v439_v50, %s1911_s8  ;;  %v376_v31 = vpop.permute.xlu0 %375  ;;  %v378_v25 = vpop.permute.xlu1 %377  ;;  %v305_v17 = vsel %vm298_vm5, %v2256_v60, %v2254_v59  ;;  %v337_v54 = vsel %vm298_vm5, %v2254_v59, %v2256_v60  ;;  %v444_v55 = vsel %vm2068_vm4, %v428_v33, %v1994_v11  ;;  %v612_v47 = vshra.s32 %v2047_v35, 2 }
 0x175   :  { %v386_v42 = vsel %vm379_vm6, %v376_v31, %v2272_v41  ;;  %v410_v53 = vsel %vm379_vm6, %v2272_v41, %v376_v31  ;;  %v445_v37 = vsel %vm2068_vm4, %v429_v24, %v1992_v10  ;;  %v387_v59 = vsel %vm379_vm6, %v378_v25, %v2270_v27 }
 0x176   :  { %v430_v41 = vsel %vm416_vm7, %v305_v17, %v410_v53  ;;  %v431_v20 = vsel %vm417_vm8, %v337_v54, %v386_v42  ;;  %v411_v60 = vsel %vm379_vm6, %v2270_v27, %v378_v25  ;;  %v306_v21 = vsel %vm298_vm5, %v2260_v63, %v2258_v40 }
 0x177   :  { %v338_v49 = vsel %vm298_vm5, %v2258_v40, %v2260_v63  ;;  %v446_v16 = vsel %vm2068_vm4, %v430_v41, %v2000_v13  ;;  %v447_v56 = vsel %vm2068_vm4, %v431_v20, %v1998_v12  ;;  %v432_v27 = vsel %vm416_vm7, %v306_v21, %v411_v60 }
 0x178   :  { %478 = vrot.lane.b32.xlu0 %v440_v36, %s1911_s8  ;;  %480 = vrot.lane.b32.xlu1 %v441_v22, %s1911_s8  ;;  %v433_v57 = vsel %vm417_vm8, %v338_v49, %v387_v59  ;;  %v448_v40 = vsel %vm2068_vm4, %v432_v27, %v2006_v15  ;;  %v2466_v24 = vand.u32 1, %v612_v47  ;;  %vm1101_vm6 = vcmask 785408  }
 0x179   :  { %v449_v63 = vsel %vm2068_vm4, %v433_v57, %v2004_v14  ;;  %vm1182_vm7 = vcmask 261120  }
 0x17a   :  { %vm616_vm11 = vcmp.eq.s32.totalorder %v2466_v24, 0 }
 0x17c   :  { %482 = vrot.lane.b32.xlu0 %v442_v62, %s1911_s8  ;;  %484 = vrot.lane.b32.xlu1 %v443_v45, %s1911_s8 }
 0x180   :  { %486 = vrot.lane.b32.xlu0 %v444_v55, %s1911_s8  ;;  %488 = vrot.lane.b32.xlu1 %v445_v37, %s1911_s8 }
 0x184   :  { %490 = vrot.lane.b32.xlu0 %v446_v16, %s1911_s8  ;;  %492 = vrot.lane.b32.xlu1 %v447_v56, %s1911_s8 }
 0x188   :  { %494 = vrot.lane.b32.xlu0 %v448_v40, %s1911_s8  ;;  %496 = vrot.lane.b32.xlu1 %v449_v63, %s1911_s8 }
 0x18c   :  { %539 = vrot.lane.b32.xlu0 %v2296_v23, %s1912_s9  ;;  %541 = vrot.lane.b32.xlu1 %v2318_v19, %s1912_s9 }
 0x190   :  { %543 = vrot.lane.b32.xlu0 %v439_v50, %s1912_s9  ;;  %545 = vrot.lane.b32.xlu1 %v441_v22, %s1912_s9 }
 0x194   :  { %547 = vrot.lane.b32.xlu0 %v443_v45, %s1912_s9  ;;  %549 = vrot.lane.b32.xlu1 %v445_v37, %s1912_s9 }
 0x198   :  { %551 = vrot.lane.b32.xlu0 %v447_v56, %s1912_s9  ;;  %553 = vrot.lane.b32.xlu1 %v449_v63, %s1912_s9 }
 0x19c   :  { %563 = vrot.lane.b32.xlu0 %v2291_v43, %s1912_s9  ;;  %565 = vrot.lane.b32.xlu1 %v2313_v18, %s1912_s9 }
 0x1a0   :  { %567 = vrot.lane.b32.xlu0 %v2335_v44, %s1912_s9  ;;  %569 = vrot.lane.b32.xlu1 %v440_v36, %s1912_s9 }
 0x1a4   :  { %571 = vrot.lane.b32.xlu0 %v442_v62, %s1912_s9  ;;  %573 = vrot.lane.b32.xlu1 %v444_v55, %s1912_s9  ;;  %v613_v62 = vshra.s32 %v2050_v38, 2 }
 0x1a6   :  { %v2468_v42 = vand.u32 1, %v613_v62 }
 0x1a8   :  { %575 = vrot.lane.b32.xlu0 %v446_v16, %s1912_s9  ;;  %577 = vrot.lane.b32.xlu1 %v448_v40, %s1912_s9  ;;  %vm617_vm12 = vcmp.eq.s32.totalorder %v2468_v42, 0 }
 0x1de   :  { %v469_v34 = vpop.permute.xlu1 %468  ;;  %v467_v26 = vpop.permute.xlu0 %466 }
 0x1df   :  { %v499_v17 = vsel %vm498_vm9, %v467_v26, %v469_v34  ;;  %v531_v54 = vsel %vm498_vm9, %v469_v34, %v467_v26 }
 0x1e2   :  { %v473_v23 = vpop.permute.xlu1 %472  ;;  %v471_v19 = vpop.permute.xlu0 %470 }
 0x1e3   :  { %v500_v16 = vsel %vm498_vm9, %v471_v19, %v473_v23  ;;  %v532_v56 = vsel %vm498_vm9, %v473_v23, %v471_v19 }
 0x1e6   :  { %v477_v50 = vpop.permute.xlu1 %476  ;;  %v475_v28 = vpop.permute.xlu0 %474 }
 0x1ea   :  { %v481_v29 = vpop.permute.xlu1 %480  ;;  %v479_v51 = vpop.permute.xlu0 %478 }
 0x1ee   :  { %v2446_v52 = vpop.permute.xlu1 %484  ;;  %v2448_v43 = vpop.permute.xlu0 %482 }
 0x1f2   :  { %v2450_v18 = vpop.permute.xlu1 %488  ;;  %v2452_v44 = vpop.permute.xlu0 %486 }
 0x1f6   :  { %v2454_v36 = vpop.permute.xlu1 %492  ;;  %v2456_v22 = vpop.permute.xlu0 %490 }
 0x1fa   :  { %v2458_v39 = vpop.permute.xlu1 %496  ;;  %v2460_v30 = vpop.permute.xlu0 %494 }
 0x1fe   :  { %v542_v58 = vpop.permute.xlu1 %541  ;;  %v540_v61 = vpop.permute.xlu0 %539 }
 0x202   :  { %v546_v31 = vpop.permute.xlu1 %545  ;;  %v544_v46 = vpop.permute.xlu0 %543 }
 0x206   :  { %v2464_v45 = vpop.permute.xlu1 %549  ;;  %v548_v33 = vpop.permute.xlu0 %547 }
 0x20a   :  { %v2470_v53 = vpop.permute.xlu1 %553  ;;  %v2472_v25 = vpop.permute.xlu0 %551 }
 0x20e   :  { %v566_v55 = vpop.permute.xlu1 %565  ;;  %v564_v37 = vpop.permute.xlu0 %563 }
 0x20f   :  { %v581_v41 = vsel %vm579_vm10, %v566_v55, %v542_v58  ;;  %v605_v20 = vsel %vm579_vm10, %v542_v58, %v566_v55  ;;  %v580_v59 = vsel %vm579_vm10, %v564_v37, %v540_v61  ;;  %v604_v60 = vsel %vm579_vm10, %v540_v61, %v564_v37 }
 0x210   :  { %v618_v21 = vsel %vm616_vm11, %v499_v17, %v604_v60  ;;  %v619_v49 = vsel %vm617_vm12, %v531_v54, %v580_v59  ;;  %v620_v63 = vsel %vm616_vm11, %v500_v16, %v605_v20  ;;  %v621_v34 = vsel %vm617_vm12, %v532_v56, %v581_v41 }
 0x211   :  { %v2491_v27 = vsel %vm2068_vm4, %v618_v21, %v1964_v1  ;;  %v2496_v57 = vsel %vm2068_vm4, %v619_v49, %v1970_v3  ;;  %v501_v58 = vsel %vm498_vm9, %v475_v28, %v477_v50  ;;  %v533_v61 = vsel %vm498_vm9, %v477_v50, %v475_v28 }
 0x212   :  { %666 = vrot.lane.b32.xlu0 %v2491_v27, %s1913_s10  ;;  %668 = vrot.lane.b32.xlu1 %v2496_v57, %s1913_s10  ;;  %v568_v40 = vpop.permute.xlu0 %567  ;;  %v570_v19 = vpop.permute.xlu1 %569  ;;  %v2513_v47 = vsel %vm2068_vm4, %v620_v63, %v1962_v0  ;;  %v2518_v62 = vsel %vm2068_vm4, %v621_v34, %v1968_v2  ;;  %v502_v2 = vsel %vm498_vm9, %v479_v51, %v481_v29 }
 0x213   :  { %v582_v26 = vsel %vm579_vm10, %v568_v40, %v544_v46  ;;  %v606_v23 = vsel %vm579_vm10, %v544_v46, %v568_v40  ;;  %v583_v0 = vsel %vm579_vm10, %v570_v19, %v546_v31  ;;  %v607_v28 = vsel %vm579_vm10, %v546_v31, %v570_v19 }
 0x214   :  { %v622_v46 = vsel %vm616_vm11, %v501_v58, %v606_v23  ;;  %v623_v50 = vsel %vm617_vm12, %v533_v61, %v582_v26  ;;  %v534_v54 = vsel %vm498_vm9, %v481_v29, %v479_v51  ;;  %v624_v31 = vsel %vm616_vm11, %v502_v2, %v607_v28 }
 0x215   :  { %v2535_v55 = vsel %vm2068_vm4, %v622_v46, %v1976_v5  ;;  %v639_v37 = vsel %vm2068_vm4, %v623_v50, %v1974_v4  ;;  %v625_v29 = vsel %vm617_vm12, %v534_v54, %v583_v0  ;;  %v503_v4 = vsel %vm498_vm9, %v2448_v43, %v2446_v52 }
 0x216   :  { %670 = vrot.lane.b32.xlu0 %v2513_v47, %s1913_s10  ;;  %672 = vrot.lane.b32.xlu1 %v2518_v62, %s1913_s10  ;;  %v572_v17 = vpop.permute.xlu0 %571  ;;  %v574_v41 = vpop.permute.xlu1 %573  ;;  %v535_v20 = vsel %vm498_vm9, %v2446_v52, %v2448_v43  ;;  %v640_v59 = vsel %vm2068_vm4, %v624_v31, %v1982_v7  ;;  %v641_v60 = vsel %vm2068_vm4, %v625_v29, %v1980_v6  ;;  %v812_v29 = vshra.s32 %v2047_v35, 3 }
 0x217   :  { %v584_v51 = vsel %vm579_vm10, %v572_v17, %v548_v33  ;;  %v608_v5 = vsel %vm579_vm10, %v548_v33, %v572_v17  ;;  %v585_v52 = vsel %vm579_vm10, %v574_v41, %v2464_v45  ;;  %v609_v7 = vsel %vm579_vm10, %v2464_v45, %v574_v41 }
 0x218   :  { %v626_v33 = vsel %vm616_vm11, %v503_v4, %v608_v5  ;;  %v627_v21 = vsel %vm617_vm12, %v535_v20, %v584_v51  ;;  %v504_v6 = vsel %vm498_vm9, %v2452_v44, %v2450_v18  ;;  %v536_v49 = vsel %vm498_vm9, %v2450_v18, %v2452_v44 }
 0x219   :  { %v642_v16 = vsel %vm2068_vm4, %v626_v33, %v1988_v9  ;;  %v643_v56 = vsel %vm2068_vm4, %v627_v21, %v1986_v8  ;;  %v628_v45 = vsel %vm616_vm11, %v504_v6, %v609_v7  ;;  %v629_v40 = vsel %vm617_vm12, %v536_v49, %v585_v52 }
 0x21a   :  { %674 = vrot.lane.b32.xlu0 %v2535_v55, %s1913_s10  ;;  %676 = vrot.lane.b32.xlu1 %v639_v37, %s1913_s10  ;;  %v576_v43 = vpop.permute.xlu0 %575  ;;  %v578_v44 = vpop.permute.xlu1 %577  ;;  %v505_v8 = vsel %vm498_vm9, %v2456_v22, %v2454_v36  ;;  %v537_v63 = vsel %vm498_vm9, %v2454_v36, %v2456_v22  ;;  %v644_v34 = vsel %vm2068_vm4, %v628_v45, %v1994_v11  ;;  %v813_v51 = vshra.s32 %v2050_v38, 3 }
 0x21b   :  { %v586_v18 = vsel %vm579_vm10, %v576_v43, %v2472_v25  ;;  %v610_v9 = vsel %vm579_vm10, %v2472_v25, %v576_v43  ;;  %v645_v26 = vsel %vm2068_vm4, %v629_v40, %v1992_v10  ;;  %v587_v36 = vsel %vm579_vm10, %v578_v44, %v2470_v53 }
 0x21c   :  { %v630_v25 = vsel %vm616_vm11, %v505_v8, %v610_v9  ;;  %v631_v23 = vsel %vm617_vm12, %v537_v63, %v586_v18  ;;  %v611_v11 = vsel %vm579_vm10, %v2470_v53, %v578_v44  ;;  %v506_v10 = vsel %vm498_vm9, %v2460_v30, %v2458_v39 }
 0x21d   :  { %v538_v22 = vsel %vm498_vm9, %v2458_v39, %v2460_v30  ;;  %v646_v19 = vsel %vm2068_vm4, %v630_v25, %v2000_v13  ;;  %v647_v58 = vsel %vm2068_vm4, %v631_v23, %v1998_v12  ;;  %v632_v53 = vsel %vm616_vm11, %v506_v10, %v611_v11  ;;  %v1830_v10 = vld [vmem:[#allocation4 + $0x18] sm:$0xff] }
 0x21e   :  { %678 = vrot.lane.b32.xlu0 %v640_v59, %s1913_s10  ;;  %680 = vrot.lane.b32.xlu1 %v641_v60, %s1913_s10  ;;  %v633_v61 = vsel %vm617_vm12, %v538_v22, %v587_v36  ;;  %v648_v39 = vsel %vm2068_vm4, %v632_v53, %v2006_v15  ;;  %v2670_v4 = vand.u32 1, %v812_v29  ;;  %v2672_v20 = vand.u32 1, %v813_v51  ;;  %v1829_v36 = vld [vmem:[#allocation4 + $0x10] sm:$0xff] }
 0x21f   :  { %v649_v13 = vsel %vm2068_vm4, %v633_v61, %v2004_v14  ;;  %v1833_v29 = vld [vmem:[#allocation4 + $0x30] sm:$0xff]  ;;  %vm1301_vm10 = vcmask 523264  }
 0x220   :  { %vm816_vm15 = vcmp.eq.s32.totalorder %v2670_v4, 0  ;;  %vm817_vm0 = vcmp.eq.s32.totalorder %v2672_v20, 0 }
 0x222   :  { %682 = vrot.lane.b32.xlu0 %v642_v16, %s1913_s10  ;;  %684 = vrot.lane.b32.xlu1 %v643_v56, %s1913_s10 }
 0x226   :  { %686 = vrot.lane.b32.xlu0 %v644_v34, %s1913_s10  ;;  %688 = vrot.lane.b32.xlu1 %v645_v26, %s1913_s10 }
 0x22a   :  { %690 = vrot.lane.b32.xlu0 %v646_v19, %s1913_s10  ;;  %692 = vrot.lane.b32.xlu1 %v647_v58, %s1913_s10 }
 0x22e   :  { %694 = vrot.lane.b32.xlu0 %v648_v39, %s1913_s10  ;;  %696 = vrot.lane.b32.xlu1 %v649_v13, %s1913_s10 }
 0x232   :  { %739 = vrot.lane.b32.xlu0 %v2496_v57, %s1914_s11  ;;  %741 = vrot.lane.b32.xlu1 %v2518_v62, %s1914_s11 }
 0x236   :  { %743 = vrot.lane.b32.xlu0 %v639_v37, %s1914_s11  ;;  %745 = vrot.lane.b32.xlu1 %v641_v60, %s1914_s11 }
 0x23a   :  { %747 = vrot.lane.b32.xlu0 %v643_v56, %s1914_s11  ;;  %749 = vrot.lane.b32.xlu1 %v645_v26, %s1914_s11 }
 0x23e   :  { %751 = vrot.lane.b32.xlu0 %v647_v58, %s1914_s11  ;;  %753 = vrot.lane.b32.xlu1 %v649_v13, %s1914_s11 }
 0x242   :  { %763 = vrot.lane.b32.xlu0 %v2491_v27, %s1914_s11  ;;  %765 = vrot.lane.b32.xlu1 %v2513_v47, %s1914_s11 }
 0x246   :  { %767 = vrot.lane.b32.xlu0 %v2535_v55, %s1914_s11  ;;  %769 = vrot.lane.b32.xlu1 %v640_v59, %s1914_s11 }
 0x24a   :  { %771 = vrot.lane.b32.xlu0 %v642_v16, %s1914_s11  ;;  %773 = vrot.lane.b32.xlu1 %v644_v34, %s1914_s11 }
 0x24e   :  { %775 = vrot.lane.b32.xlu0 %v646_v19, %s1914_s11  ;;  %777 = vrot.lane.b32.xlu1 %v648_v39, %s1914_s11 }
 0x284   :  { %v669_v12 = vpop.permute.xlu1 %668  ;;  %v667_v14 = vpop.permute.xlu0 %666 }
 0x285   :  { %v699_v33 = vsel %vm698_vm13, %v667_v14, %v669_v12  ;;  %v731_v21 = vsel %vm698_vm13, %v669_v12, %v667_v14  ;;  %v1831_v14 = vld [vmem:[#allocation4 + $0x20] sm:$0xff] }
 0x288   :  { %v673_v15 = vpop.permute.xlu1 %672  ;;  %v671_v30 = vpop.permute.xlu0 %670 }
 0x289   :  { %v700_v40 = vsel %vm698_vm13, %v671_v30, %v673_v15  ;;  %v732_v18 = vsel %vm698_vm13, %v673_v15, %v671_v30  ;;  %v1832_v30 = vld [vmem:[#allocation4 + $0x28] sm:$0xff] }
 0x28c   :  { %v677_v24 = vpop.permute.xlu1 %676  ;;  %v675_v42 = vpop.permute.xlu0 %674 }
 0x28d   :  { %v701_v25 = vsel %vm698_vm13, %v675_v42, %v677_v24  ;;  %v733_v23 = vsel %vm698_vm13, %v677_v24, %v675_v42 }
 0x290   :  { %v2646_v57 = vpop.permute.xlu1 %680  ;;  %v2648_v62 = vpop.permute.xlu0 %678 }
 0x291   :  { %v702_v13 = vsel %vm698_vm13, %v2648_v62, %v2646_v57  ;;  %v734_v12 = vsel %vm698_vm13, %v2646_v57, %v2648_v62 }
 0x294   :  { %v2650_v27 = vpop.permute.xlu1 %684  ;;  %v2652_v47 = vpop.permute.xlu0 %682 }
 0x298   :  { %v2654_v46 = vpop.permute.xlu1 %688  ;;  %v2656_v50 = vpop.permute.xlu0 %686 }
 0x29c   :  { %v2658_v0 = vpop.permute.xlu1 %692  ;;  %v2660_v28 = vpop.permute.xlu0 %690 }
 0x2a0   :  { %v2662_v17 = vpop.permute.xlu1 %696  ;;  %v2664_v2 = vpop.permute.xlu0 %694 }
 0x2a4   :  { %v742_v54 = vpop.permute.xlu1 %741  ;;  %v740_v55 = vpop.permute.xlu0 %739 }
 0x2a8   :  { %v746_v37 = vpop.permute.xlu1 %745  ;;  %v744_v31 = vpop.permute.xlu0 %743 }
 0x2ac   :  { %v2668_v5 = vpop.permute.xlu1 %749  ;;  %v748_v41 = vpop.permute.xlu0 %747 }
 0x2b0   :  { %v2674_v59 = vpop.permute.xlu1 %753  ;;  %v2676_v60 = vpop.permute.xlu0 %751 }
 0x2b4   :  { %v766_v52 = vpop.permute.xlu1 %765  ;;  %v764_v7 = vpop.permute.xlu0 %763 }
 0x2b5   :  { %v781_v43 = vsel %vm779_vm14, %v766_v52, %v742_v54  ;;  %v805_v6 = vsel %vm779_vm14, %v742_v54, %v766_v52  ;;  %v780_v49 = vsel %vm779_vm14, %v764_v7, %v740_v55  ;;  %v804_v16 = vsel %vm779_vm14, %v740_v55, %v764_v7 }
 0x2b6   :  { %v818_v56 = vsel %vm816_vm15, %v699_v33, %v804_v16  ;;  %v819_v45 = vsel %vm817_vm0, %v731_v21, %v780_v49  ;;  %v820_v8 = vsel %vm816_vm15, %v700_v40, %v805_v6  ;;  %v821_v63 = vsel %vm817_vm0, %v732_v18, %v781_v43  ;;  %v1834_v33 = vld [vmem:[#allocation4 + $0x38] sm:$0xff]  ;;  %v1835_v49 = vld [vmem:[#allocation4 + $0x40] sm:$0xff] }
 0x2b7   :  { %v2695_v9 = vsel %vm2068_vm4, %v818_v56, %v1964_v1  ;;  %v2700_v44 = vsel %vm2068_vm4, %v819_v45, %v1970_v3  ;;  %v2716_v11 = vsel %vm2068_vm4, %v820_v8, %v1829_v36  ;;  %v2720_v22 = vsel %vm2068_vm4, %v821_v63, %v1830_v10  ;;  %v1836_v56 = vld [vmem:[#allocation4 + $0x48] sm:$0xff]  ;;  %v1839_v10 = vld [vmem:[#allocation4 + $0x60] sm:$0xff] }
 0x2b8   :  { %869 = vrot.lane.b32.xlu0 %v2695_v9, %s1915_s12  ;;  %871 = vrot.lane.b32.xlu1 %v2700_v44, %s1915_s12  ;;  %v768_v1 = vpop.permute.xlu0 %767  ;;  %v770_v3 = vpop.permute.xlu1 %769  ;;  %v704_v43 = vsel %vm698_vm13, %v2656_v50, %v2654_v46  ;;  %v736_v6 = vsel %vm698_vm13, %v2654_v46, %v2656_v50  ;;  %v705_v8 = vsel %vm698_vm13, %v2660_v28, %v2658_v0 }
 0x2b9   :  { %v782_v34 = vsel %vm779_vm14, %v768_v1, %v744_v31  ;;  %v806_v26 = vsel %vm779_vm14, %v744_v31, %v768_v1  ;;  %v783_v53 = vsel %vm779_vm14, %v770_v3, %v746_v37  ;;  %v807_v61 = vsel %vm779_vm14, %v746_v37, %v770_v3  ;;  %v1837_v1 = vld [vmem:[#allocation4 + $0x50] sm:$0xff] }
 0x2ba   :  { %v822_v19 = vsel %vm816_vm15, %v701_v25, %v806_v26  ;;  %v823_v58 = vsel %vm817_vm0, %v733_v23, %v782_v34  ;;  %v824_v42 = vsel %vm816_vm15, %v702_v13, %v807_v61  ;;  %v825_v54 = vsel %vm817_vm0, %v734_v12, %v783_v53  ;;  %v1838_v26 = vld [vmem:[#allocation4 + $0x58] sm:$0xff] }
 0x2bb   :  { %v2740_v15 = vsel %vm2068_vm4, %v822_v19, %v1831_v14  ;;  %v2744_v24 = vsel %vm2068_vm4, %v823_v58, %v1832_v30  ;;  %v703_v37 = vsel %vm698_vm13, %v2652_v47, %v2650_v27  ;;  %v735_v31 = vsel %vm698_vm13, %v2650_v27, %v2652_v47  ;;  %v1840_v58 = vld [vmem:[#allocation4 + $0x68] sm:$0xff] }
 0x2bc   :  { %873 = vrot.lane.b32.xlu0 %v2716_v11, %s1915_s12  ;;  %875 = vrot.lane.b32.xlu1 %v2720_v22, %s1915_s12  ;;  %v772_v39 = vpop.permute.xlu0 %771  ;;  %v774_v55 = vpop.permute.xlu1 %773  ;;  %v2764_v51 = vsel %vm2068_vm4, %v824_v42, %v1833_v29  ;;  %v2768_v21 = vsel %vm2068_vm4, %v825_v54, %v1834_v33  ;;  %v737_v63 = vsel %vm698_vm13, %v2658_v0, %v2660_v28 }
 0x2bd   :  { %v784_v57 = vsel %vm779_vm14, %v772_v39, %v748_v41  ;;  %v808_v62 = vsel %vm779_vm14, %v748_v41, %v772_v39  ;;  %v785_v27 = vsel %vm779_vm14, %v774_v55, %v2668_v5  ;;  %v809_v47 = vsel %vm779_vm14, %v2668_v5, %v774_v55  ;;  %v1842_v39 = vld [vmem:[#allocation4 + $0x78] sm:$0xff] }
 0x2be   :  { %v826_v41 = vsel %vm816_vm15, %v703_v37, %v808_v62  ;;  %v827_v52 = vsel %vm817_vm0, %v735_v31, %v784_v57  ;;  %v828_v5 = vsel %vm816_vm15, %v704_v43, %v809_v47  ;;  %v829_v40 = vsel %vm817_vm0, %v736_v6, %v785_v27 }
 0x2bf   :  { %v2790_v16 = vsel %vm2068_vm4, %v826_v41, %v1835_v49  ;;  %v2794_v45 = vsel %vm2068_vm4, %v827_v52, %v1836_v56  ;;  %v2816_v34 = vsel %vm2068_vm4, %v828_v5, %v1837_v1  ;;  %v2820_v3 = vsel %vm2068_vm4, %v829_v40, %v1838_v26 }
 0x2c0   :  { %877 = vrot.lane.b32.xlu0 %v2740_v15, %s1915_s12  ;;  %879 = vrot.lane.b32.xlu1 %v2744_v24, %s1915_s12  ;;  %v776_v7 = vpop.permute.xlu0 %775  ;;  %v778_v18 = vpop.permute.xlu1 %777  ;;  %v706_v23 = vsel %vm698_vm13, %v2664_v2, %v2662_v17  ;;  %v738_v36 = vsel %vm698_vm13, %v2662_v17, %v2664_v2  ;;  %v1841_v17 = vld [vmem:[#allocation4 + $0x70] sm:$0xff]  ;;  %v1015_v43 = vshra.s32 %v2047_v35, 4  ;;  %v1016_v6 = vshra.s32 %v2050_v38, 4 }
 0x2c1   :  { %v786_v46 = vsel %vm779_vm14, %v776_v7, %v2676_v60  ;;  %v810_v50 = vsel %vm779_vm14, %v2676_v60, %v776_v7  ;;  %v787_v0 = vsel %vm779_vm14, %v778_v18, %v2674_v59  ;;  %v811_v28 = vsel %vm779_vm14, %v2674_v59, %v778_v18 }
 0x2c2   :  { %v830_v60 = vsel %vm816_vm15, %v705_v8, %v810_v50  ;;  %v831_v25 = vsel %vm817_vm0, %v737_v63, %v786_v46  ;;  %v832_v59 = vsel %vm816_vm15, %v706_v23, %v811_v28  ;;  %v833_v61 = vsel %vm817_vm0, %v738_v36, %v787_v0 }
 0x2c3   :  { %v2842_v19 = vsel %vm2068_vm4, %v830_v60, %v1839_v10  ;;  %v2846_v53 = vsel %vm2068_vm4, %v831_v25, %v1840_v58  ;;  %v2858_v2 = vsel %vm2068_vm4, %v832_v59, %v1841_v17  ;;  %v2862_v13 = vsel %vm2068_vm4, %v833_v61, %v1842_v39 }
 0x2c4   :  { %881 = vrot.lane.b32.xlu0 %v2764_v51, %s1915_s12  ;;  %883 = vrot.lane.b32.xlu1 %v2768_v21, %s1915_s12  ;;  %v2924_v5 = vand.u32 1, %v1015_v43  ;;  %v2926_v40 = vand.u32 1, %v1016_v6  ;;  %v851_v18 = vstv %s1811_s13 }
 0x2c5   :  { %vm2934_vm5 = vcmp.ne.s32.totalorder %v851_v18, 0 }
 0x2c6   :  { %vm1019_vm3 = vcmp.eq.s32.totalorder %v2924_v5, 0  ;;  %vm1020_vm4 = vcmp.eq.s32.totalorder %v2926_v40, 0 }
 0x2c8   :  { %885 = vrot.lane.b32.xlu0 %v2790_v16, %s1915_s12  ;;  %887 = vrot.lane.b32.xlu1 %v2794_v45, %s1915_s12 }
 0x2cc   :  { %889 = vrot.lane.b32.xlu0 %v2816_v34, %s1915_s12  ;;  %891 = vrot.lane.b32.xlu1 %v2820_v3, %s1915_s12 }
 0x2d0   :  { %893 = vrot.lane.b32.xlu0 %v2842_v19, %s1915_s12  ;;  %895 = vrot.lane.b32.xlu1 %v2846_v53, %s1915_s12 }
 0x2d4   :  { %897 = vrot.lane.b32.xlu0 %v2858_v2, %s1915_s12  ;;  %899 = vrot.lane.b32.xlu1 %v2862_v13, %s1915_s12 }
 0x2d8   :  { %942 = vrot.lane.b32.xlu0 %v2700_v44, %s1906_s29  ;;  %944 = vrot.lane.b32.xlu1 %v2720_v22, %s1906_s29 }
 0x2dc   :  { %946 = vrot.lane.b32.xlu0 %v2744_v24, %s1906_s29  ;;  %948 = vrot.lane.b32.xlu1 %v2768_v21, %s1906_s29 }
 0x2e0   :  { %950 = vrot.lane.b32.xlu0 %v2794_v45, %s1906_s29  ;;  %952 = vrot.lane.b32.xlu1 %v2820_v3, %s1906_s29 }
 0x2e4   :  { %954 = vrot.lane.b32.xlu0 %v2846_v53, %s1906_s29  ;;  %956 = vrot.lane.b32.xlu1 %v2862_v13, %s1906_s29 }
 0x2e8   :  { %966 = vrot.lane.b32.xlu0 %v2695_v9, %s1906_s29  ;;  %968 = vrot.lane.b32.xlu1 %v2716_v11, %s1906_s29 }
 0x2ec   :  { %970 = vrot.lane.b32.xlu0 %v2740_v15, %s1906_s29  ;;  %972 = vrot.lane.b32.xlu1 %v2764_v51, %s1906_s29 }
 0x2f0   :  { %974 = vrot.lane.b32.xlu0 %v2790_v16, %s1906_s29  ;;  %976 = vrot.lane.b32.xlu1 %v2816_v34, %s1906_s29 }
 0x2f4   :  { %978 = vrot.lane.b32.xlu0 %v2842_v19, %s1906_s29  ;;  %980 = vrot.lane.b32.xlu1 %v2858_v2, %s1906_s29 }
 0x32a   :  { %v872_v48 = vpop.permute.xlu1 %871  ;;  %v870_v4 = vpop.permute.xlu0 %869 }
 0x32b   :  { %v902_v63 = vsel %vm901_vm1, %v870_v4, %v872_v48  ;;  %v934_v1 = vsel %vm901_vm1, %v872_v48, %v870_v4 }
 0x32e   :  { %v876_v20 = vpop.permute.xlu1 %875  ;;  %v874_v12 = vpop.permute.xlu0 %873 }
 0x32f   :  { %v903_v58 = vsel %vm901_vm1, %v874_v12, %v876_v20  ;;  %v935_v59 = vsel %vm901_vm1, %v876_v20, %v874_v12 }
 0x332   :  { %v880_v14 = vpop.permute.xlu1 %879  ;;  %v878_v30 = vpop.permute.xlu0 %877 }
 0x333   :  { %v936_v43 = vsel %vm901_vm1, %v880_v14, %v878_v30 }
 0x336   :  { %v2900_v42 = vpop.permute.xlu1 %883  ;;  %v2902_v54 = vpop.permute.xlu0 %881 }
 0x33a   :  { %v2904_v57 = vpop.permute.xlu1 %887  ;;  %v2906_v62 = vpop.permute.xlu0 %885 }
 0x33e   :  { %v2908_v55 = vpop.permute.xlu1 %891  ;;  %v2910_v37 = vpop.permute.xlu0 %889 }
 0x342   :  { %v2912_v31 = vpop.permute.xlu1 %895  ;;  %v2914_v29 = vpop.permute.xlu0 %893 }
 0x346   :  { %v2916_v33 = vpop.permute.xlu1 %899  ;;  %v2918_v41 = vpop.permute.xlu0 %897 }
 0x34a   :  { %v945_v52 = vpop.permute.xlu1 %944  ;;  %v943_v27 = vpop.permute.xlu0 %942 }
 0x34e   :  { %v949_v47 = vpop.permute.xlu1 %948  ;;  %v947_v7 = vpop.permute.xlu0 %946 }
 0x352   :  { %v2922_v49 = vpop.permute.xlu1 %952  ;;  %v951_v56 = vpop.permute.xlu0 %950 }
 0x356   :  { %v2928_v46 = vpop.permute.xlu1 %956  ;;  %v2930_v50 = vpop.permute.xlu0 %954 }
 0x35a   :  { %v969_v26 = vpop.permute.xlu1 %968  ;;  %v967_v60 = vpop.permute.xlu0 %966 }
 0x35b   :  { %v984_v25 = vsel %vm982_vm2, %v969_v26, %v945_v52  ;;  %v1008_v0 = vsel %vm982_vm2, %v945_v52, %v969_v26  ;;  %v983_v28 = vsel %vm982_vm2, %v967_v60, %v943_v27  ;;  %v1007_v23 = vsel %vm982_vm2, %v943_v27, %v967_v60 }
 0x35c   :  { %v1021_v36 = vsel %vm1019_vm3, %v902_v63, %v1007_v23  ;;  %v1022_v10 = vsel %vm1020_vm4, %v934_v1, %v983_v28  ;;  %v1023_v39 = vsel %vm1019_vm3, %v903_v58, %v1008_v0  ;;  %v1024_v48 = vsel %vm1020_vm4, %v935_v59, %v984_v25 }
 0x35d   :  { %v2953_v61 = vsel %vm2934_vm5, %v1021_v36, %v2695_v9  ;;  %v2958_v17 = vsel %vm2934_vm5, %v1022_v10, %v2700_v44  ;;  %v904_v27 = vsel %vm901_vm1, %v878_v30, %v880_v14  ;;  %v2975_v6 = vsel %vm2934_vm5, %v1023_v39, %v2716_v11 }
 0x35e   :  { %1069 = vrot.lane.b32.xlu0 %v2953_v61, %s1916_s14  ;;  %1071 = vrot.lane.b32.xlu1 %v2958_v17, %s1916_s14  ;;  %v971_v4 = vpop.permute.xlu0 %970  ;;  %v973_v52 = vpop.permute.xlu1 %972  ;;  %v2980_v18 = vsel %vm2934_vm5, %v1024_v48, %v2720_v22  ;;  %v905_v26 = vsel %vm901_vm1, %v2902_v54, %v2900_v42  ;;  %v937_v60 = vsel %vm901_vm1, %v2900_v42, %v2902_v54 }
 0x35f   :  { %v985_v20 = vsel %vm982_vm2, %v971_v4, %v947_v7  ;;  %v1009_v12 = vsel %vm982_vm2, %v947_v7, %v971_v4  ;;  %v986_v14 = vsel %vm982_vm2, %v973_v52, %v949_v47  ;;  %v1010_v30 = vsel %vm982_vm2, %v949_v47, %v973_v52 }
 0x360   :  { %v1025_v63 = vsel %vm1019_vm3, %v904_v27, %v1009_v12  ;;  %v1026_v7 = vsel %vm1020_vm4, %v936_v43, %v985_v20  ;;  %v1027_v47 = vsel %vm1019_vm3, %v905_v26, %v1010_v30  ;;  %v1028_v28 = vsel %vm1020_vm4, %v937_v60, %v986_v14 }
 0x361   :  { %v3001_v25 = vsel %vm2934_vm5, %v1025_v63, %v2740_v15  ;;  %v1042_v0 = vsel %vm2934_vm5, %v1026_v7, %v2744_v24  ;;  %v906_v36 = vsel %vm901_vm1, %v2906_v62, %v2904_v57  ;;  %v938_v10 = vsel %vm901_vm1, %v2904_v57, %v2906_v62 }
 0x362   :  { %1073 = vrot.lane.b32.xlu0 %v2975_v6, %s1916_s14  ;;  %1075 = vrot.lane.b32.xlu1 %v2980_v18, %s1916_s14  ;;  %v975_v1 = vpop.permute.xlu0 %974  ;;  %v977_v23 = vpop.permute.xlu1 %976  ;;  %v1043_v58 = vsel %vm2934_vm5, %v1027_v47, %v2764_v51  ;;  %v1044_v59 = vsel %vm2934_vm5, %v1028_v28, %v2768_v21  ;;  %v907_v4 = vsel %vm901_vm1, %v2910_v37, %v2908_v55 }
 0x363   :  { %v987_v42 = vsel %vm982_vm2, %v975_v1, %v951_v56  ;;  %v1011_v54 = vsel %vm982_vm2, %v951_v56, %v975_v1  ;;  %v988_v57 = vsel %vm982_vm2, %v977_v23, %v2922_v49  ;;  %v1012_v62 = vsel %vm982_vm2, %v2922_v49, %v977_v23 }
 0x364   :  { %v1029_v56 = vsel %vm1019_vm3, %v906_v36, %v1011_v54  ;;  %v1030_v39 = vsel %vm1020_vm4, %v938_v10, %v987_v42  ;;  %v939_v20 = vsel %vm901_vm1, %v2908_v55, %v2910_v37  ;;  %v1031_v49 = vsel %vm1019_vm3, %v907_v4, %v1012_v62 }
 0x365   :  { %v1045_v12 = vsel %vm2934_vm5, %v1029_v56, %v2790_v16  ;;  %v1046_v52 = vsel %vm2934_vm5, %v1030_v39, %v2794_v45  ;;  %v1032_v27 = vsel %vm1020_vm4, %v939_v20, %v988_v57  ;;  %v908_v63 = vsel %vm901_vm1, %v2914_v29, %v2912_v31 }
 0x366   :  { %1077 = vrot.lane.b32.xlu0 %v3001_v25, %s1916_s14  ;;  %1079 = vrot.lane.b32.xlu1 %v1042_v0, %s1916_s14  ;;  %v979_v48 = vpop.permute.xlu0 %978  ;;  %v981_v43 = vpop.permute.xlu1 %980  ;;  %v940_v7 = vsel %vm901_vm1, %v2912_v31, %v2914_v29  ;;  %v1047_v14 = vsel %vm2934_vm5, %v1031_v49, %v2816_v34  ;;  %v1048_v30 = vsel %vm2934_vm5, %v1032_v27, %v2820_v3  ;;  %v1215_v20 = vshra.s32 %v2047_v35, 5 }
 0x367   :  { %v989_v55 = vsel %vm982_vm2, %v979_v48, %v2930_v50  ;;  %v1013_v37 = vsel %vm982_vm2, %v2930_v50, %v979_v48  ;;  %v990_v31 = vsel %vm982_vm2, %v981_v43, %v2928_v46  ;;  %v1014_v29 = vsel %vm982_vm2, %v2928_v46, %v981_v43 }
 0x368   :  { %v1033_v50 = vsel %vm1019_vm3, %v908_v63, %v1013_v37  ;;  %v1034_v1 = vsel %vm1020_vm4, %v940_v7, %v989_v55  ;;  %v909_v26 = vsel %vm901_vm1, %v2918_v41, %v2916_v33  ;;  %v941_v60 = vsel %vm901_vm1, %v2916_v33, %v2918_v41 }
 0x369   :  { %v1049_v47 = vsel %vm2934_vm5, %v1033_v50, %v2842_v19  ;;  %v1050_v28 = vsel %vm2934_vm5, %v1034_v1, %v2846_v53  ;;  %v1035_v42 = vsel %vm1019_vm3, %v909_v26, %v1014_v29  ;;  %v1036_v46 = vsel %vm1020_vm4, %v941_v60, %v990_v31 }
 0x36a   :  { %1081 = vrot.lane.b32.xlu0 %v1043_v58, %s1916_s14  ;;  %1083 = vrot.lane.b32.xlu1 %v1044_v59, %s1916_s14  ;;  %v1051_v33 = vsel %vm2934_vm5, %v1035_v42, %v2858_v2  ;;  %v1052_v41 = vsel %vm2934_vm5, %v1036_v46, %v2862_v13  ;;  %v3132_v27 = vand.u32 1, %v1215_v20 }
 0x36c   :  { %vm1219_vm8 = vcmp.eq.s32.totalorder %v3132_v27, 0  ;;  %v1342_v27 = vshra.s32 %v2047_v35, 6 }
 0x36e   :  { %1085 = vrot.lane.b32.xlu0 %v1045_v12, %s1916_s14  ;;  %1087 = vrot.lane.b32.xlu1 %v1046_v52, %s1916_s14 }
 0x372   :  { %1089 = vrot.lane.b32.xlu0 %v1047_v14, %s1916_s14  ;;  %1091 = vrot.lane.b32.xlu1 %v1048_v30, %s1916_s14 }
 0x376   :  { %1093 = vrot.lane.b32.xlu0 %v1049_v47, %s1916_s14  ;;  %1095 = vrot.lane.b32.xlu1 %v1050_v28, %s1916_s14 }
 0x37a   :  { %1097 = vrot.lane.b32.xlu0 %v1051_v33, %s1916_s14  ;;  %1099 = vrot.lane.b32.xlu1 %v1052_v41, %s1916_s14 }
 0x37e   :  { %1142 = vrot.lane.b32.xlu0 %v2958_v17, %s1917_s15  ;;  %1144 = vrot.lane.b32.xlu1 %v2980_v18, %s1917_s15 }
 0x382   :  { %1146 = vrot.lane.b32.xlu0 %v1042_v0, %s1917_s15  ;;  %1148 = vrot.lane.b32.xlu1 %v1044_v59, %s1917_s15 }
 0x386   :  { %1150 = vrot.lane.b32.xlu0 %v1046_v52, %s1917_s15  ;;  %1152 = vrot.lane.b32.xlu1 %v1048_v30, %s1917_s15 }
 0x38a   :  { %1154 = vrot.lane.b32.xlu0 %v1050_v28, %s1917_s15  ;;  %1156 = vrot.lane.b32.xlu1 %v1052_v41, %s1917_s15 }
 0x38e   :  { %1166 = vrot.lane.b32.xlu0 %v2953_v61, %s1917_s15  ;;  %1168 = vrot.lane.b32.xlu1 %v2975_v6, %s1917_s15 }
 0x392   :  { %1170 = vrot.lane.b32.xlu0 %v3001_v25, %s1917_s15  ;;  %1172 = vrot.lane.b32.xlu1 %v1043_v58, %s1917_s15 }
 0x396   :  { %1174 = vrot.lane.b32.xlu0 %v1045_v12, %s1917_s15  ;;  %1176 = vrot.lane.b32.xlu1 %v1047_v14, %s1917_s15  ;;  %v1216_v12 = vshra.s32 %v2050_v38, 5 }
 0x398   :  { %v3134_v55 = vand.u32 1, %v1216_v12 }
 0x39a   :  { %1178 = vrot.lane.b32.xlu0 %v1049_v47, %s1917_s15  ;;  %1180 = vrot.lane.b32.xlu1 %v1051_v33, %s1917_s15  ;;  %vm1220_vm9 = vcmp.eq.s32.totalorder %v3134_v55, 0  ;;  %v1343_v55 = vshra.s32 %v2050_v38, 6 }
 0x3d0   :  { %v1072_v5 = vpop.permute.xlu1 %1071  ;;  %v1070_v40 = vpop.permute.xlu0 %1069 }
 0x3d1   :  { %v1102_v63 = vsel %vm1101_vm6, %v1070_v40, %v1072_v5  ;;  %v1134_v7 = vsel %vm1101_vm6, %v1072_v5, %v1070_v40 }
 0x3d4   :  { %v1076_v17 = vpop.permute.xlu1 %1075  ;;  %v1074_v18 = vpop.permute.xlu0 %1073 }
 0x3d5   :  { %v1103_v47 = vsel %vm1101_vm6, %v1074_v18, %v1076_v17  ;;  %v1135_v28 = vsel %vm1101_vm6, %v1076_v17, %v1074_v18 }
 0x3d8   :  { %v1080_v0 = vpop.permute.xlu1 %1079  ;;  %v1078_v54 = vpop.permute.xlu0 %1077 }
 0x3dc   :  { %v1084_v23 = vpop.permute.xlu1 %1083  ;;  %v1082_v36 = vpop.permute.xlu0 %1081 }
 0x3e0   :  { %v3112_v10 = vpop.permute.xlu1 %1087  ;;  %v3114_v61 = vpop.permute.xlu0 %1085 }
 0x3e4   :  { %v3116_v6 = vpop.permute.xlu1 %1091  ;;  %v3118_v25 = vpop.permute.xlu0 %1089 }
 0x3e8   :  { %v3120_v58 = vpop.permute.xlu1 %1095  ;;  %v3122_v59 = vpop.permute.xlu0 %1093 }
 0x3ec   :  { %v3124_v56 = vpop.permute.xlu1 %1099  ;;  %v3126_v39 = vpop.permute.xlu0 %1097 }
 0x3f0   :  { %v1145_v57 = vpop.permute.xlu1 %1144  ;;  %v1143_v62 = vpop.permute.xlu0 %1142 }
 0x3f4   :  { %v1149_v48 = vpop.permute.xlu1 %1148  ;;  %v1147_v4 = vpop.permute.xlu0 %1146 }
 0x3f8   :  { %v3130_v52 = vpop.permute.xlu1 %1152  ;;  %v1151_v49 = vpop.permute.xlu0 %1150 }
 0x3fc   :  { %v3136_v37 = vpop.permute.xlu1 %1156  ;;  %v3138_v43 = vpop.permute.xlu0 %1154 }
 0x400   :  { %v1169_v14 = vpop.permute.xlu1 %1168  ;;  %v1167_v30 = vpop.permute.xlu0 %1166 }
 0x401   :  { %v1184_v50 = vsel %vm1182_vm7, %v1169_v14, %v1145_v57  ;;  %v1208_v1 = vsel %vm1182_vm7, %v1145_v57, %v1169_v14  ;;  %v1183_v31 = vsel %vm1182_vm7, %v1167_v30, %v1143_v62  ;;  %v1207_v29 = vsel %vm1182_vm7, %v1143_v62, %v1167_v30 }
 0x402   :  { %v1221_v26 = vsel %vm1219_vm8, %v1102_v63, %v1207_v29  ;;  %v1222_v60 = vsel %vm1220_vm9, %v1134_v7, %v1183_v31  ;;  %v1223_v33 = vsel %vm1219_vm8, %v1103_v47, %v1208_v1  ;;  %v1224_v41 = vsel %vm1220_vm9, %v1135_v28, %v1184_v50 }
 0x403   :  { %v1237_v42 = vsel %vm2934_vm5, %v1221_v26, %v2695_v9  ;;  %v1238_v46 = vsel %vm2934_vm5, %v1222_v60, %v2700_v44  ;;  %v1104_v57 = vsel %vm1101_vm6, %v1078_v54, %v1080_v0  ;;  %v1136_v62 = vsel %vm1101_vm6, %v1080_v0, %v1078_v54 }
 0x404   :  { %1269 = vrot.lane.b32.xlu0 %v1237_v42, %s1918_s16  ;;  %1271 = vrot.lane.b32.xlu1 %v1238_v46, %s1918_s16  ;;  %v1171_v5 = vpop.permute.xlu0 %1170  ;;  %v1173_v18 = vpop.permute.xlu1 %1172  ;;  %v1239_v20 = vsel %vm2934_vm5, %v1223_v33, %v2716_v11  ;;  %v1240_v12 = vsel %vm2934_vm5, %v1224_v41, %v2720_v22  ;;  %v1105_v14 = vsel %vm1101_vm6, %v1082_v36, %v1084_v23 }
 0x405   :  { %v1185_v40 = vsel %vm1182_vm7, %v1171_v5, %v1147_v4  ;;  %v1209_v17 = vsel %vm1182_vm7, %v1147_v4, %v1171_v5  ;;  %v1186_v0 = vsel %vm1182_vm7, %v1173_v18, %v1149_v48  ;;  %v1210_v54 = vsel %vm1182_vm7, %v1149_v48, %v1173_v18 }
 0x406   :  { %v1225_v63 = vsel %vm1219_vm8, %v1104_v57, %v1209_v17  ;;  %v1226_v7 = vsel %vm1220_vm9, %v1136_v62, %v1185_v40  ;;  %v1137_v30 = vsel %vm1101_vm6, %v1084_v23, %v1082_v36  ;;  %v1227_v31 = vsel %vm1219_vm8, %v1105_v14, %v1210_v54 }
 0x407   :  { %v1241_v50 = vsel %vm2934_vm5, %v1225_v63, %v2740_v15  ;;  %v1242_v1 = vsel %vm2934_vm5, %v1226_v7, %v2744_v24  ;;  %v1228_v29 = vsel %vm1220_vm9, %v1137_v30, %v1186_v0  ;;  %v1106_v26 = vsel %vm1101_vm6, %v3114_v61, %v3112_v10 }
 0x408   :  { %1273 = vrot.lane.b32.xlu0 %v1239_v20, %s1918_s16  ;;  %1275 = vrot.lane.b32.xlu1 %v1240_v12, %s1918_s16  ;;  %v1175_v4 = vpop.permute.xlu0 %1174  ;;  %v1177_v48 = vpop.permute.xlu1 %1176  ;;  %v1138_v60 = vsel %vm1101_vm6, %v3112_v10, %v3114_v61  ;;  %v1243_v47 = vsel %vm2934_vm5, %v1227_v31, %v2764_v51  ;;  %v1244_v28 = vsel %vm2934_vm5, %v1228_v29, %v2768_v21  ;;  %v3294_v30 = vand.u32 1, %v1342_v27 }
 0x409   :  { %v1187_v23 = vsel %vm1182_vm7, %v1175_v4, %v1151_v49  ;;  %v1211_v36 = vsel %vm1182_vm7, %v1151_v49, %v1175_v4  ;;  %v1188_v10 = vsel %vm1182_vm7, %v1177_v48, %v3130_v52  ;;  %v1212_v61 = vsel %vm1182_vm7, %v3130_v52, %v1177_v48 }
 0x40a   :  { %v1229_v49 = vsel %vm1219_vm8, %v1106_v26, %v1211_v36  ;;  %v1230_v42 = vsel %vm1220_vm9, %v1138_v60, %v1187_v23  ;;  %v1107_v33 = vsel %vm1101_vm6, %v3118_v25, %v3116_v6  ;;  %v1139_v41 = vsel %vm1101_vm6, %v3116_v6, %v3118_v25 }
 0x40b   :  { %v1245_v5 = vsel %vm2934_vm5, %v1229_v49, %v2790_v16  ;;  %v1246_v40 = vsel %vm2934_vm5, %v1230_v42, %v2794_v45  ;;  %v1231_v52 = vsel %vm1219_vm8, %v1107_v33, %v1212_v61  ;;  %v1232_v17 = vsel %vm1220_vm9, %v1139_v41, %v1188_v10 }
 0x40c   :  { %1277 = vrot.lane.b32.xlu0 %v1241_v50, %s1918_s16  ;;  %1279 = vrot.lane.b32.xlu1 %v1242_v1, %s1918_s16  ;;  %v1179_v46 = vpop.permute.xlu0 %1178  ;;  %v1181_v18 = vpop.permute.xlu1 %1180  ;;  %v1108_v57 = vsel %vm1101_vm6, %v3122_v59, %v3120_v58  ;;  %v1140_v62 = vsel %vm1101_vm6, %v3120_v58, %v3122_v59  ;;  %v1247_v20 = vsel %vm2934_vm5, %v1231_v52, %v2816_v34  ;;  %v3296_v50 = vand.u32 1, %v1343_v55 }
 0x40d   :  { %v1189_v6 = vsel %vm1182_vm7, %v1179_v46, %v3138_v43  ;;  %v1213_v25 = vsel %vm1182_vm7, %v3138_v43, %v1179_v46  ;;  %v1248_v12 = vsel %vm2934_vm5, %v1232_v17, %v2820_v3  ;;  %v1190_v58 = vsel %vm1182_vm7, %v1181_v18, %v3136_v37 }
 0x40e   :  { %v1233_v43 = vsel %vm1219_vm8, %v1108_v57, %v1213_v25  ;;  %v1234_v63 = vsel %vm1220_vm9, %v1140_v62, %v1189_v6  ;;  %v1214_v59 = vsel %vm1182_vm7, %v3136_v37, %v1181_v18  ;;  %v1109_v7 = vsel %vm1101_vm6, %v3126_v39, %v3124_v56 }
 0x40f   :  { %v1141_v0 = vsel %vm1101_vm6, %v3124_v56, %v3126_v39  ;;  %v1249_v54 = vsel %vm2934_vm5, %v1233_v43, %v2842_v19  ;;  %v1250_v4 = vsel %vm2934_vm5, %v1234_v63, %v2846_v53  ;;  %v1235_v14 = vsel %vm1219_vm8, %v1109_v7, %v1214_v59 }
 0x410   :  { %1281 = vrot.lane.b32.xlu0 %v1243_v47, %s1918_s16  ;;  %1283 = vrot.lane.b32.xlu1 %v1244_v28, %s1918_s16  ;;  %v1236_v37 = vsel %vm1220_vm9, %v1141_v0, %v1190_v58  ;;  %v1251_v56 = vsel %vm2934_vm5, %v1235_v14, %v2858_v2  ;;  %v48_v1 = vshrl.u32 %v44_v32, 7  ;;  %vm1346_vm11 = vcmp.eq.s32.totalorder %v3294_v30, 0 }
 0x411   :  { %v1252_v39 = vsel %vm2934_vm5, %v1236_v37, %v2862_v13  ;;  %vm1347_vm12 = vcmp.eq.s32.totalorder %v3296_v50, 0  ;;  %v1397_v48 = vstv %s1396_s17 }
 0x412   :  { %v1661_v31 = vshra.s32 %v48_v1, 1  ;;  %v1513_v29 = vand.u32 1, %v48_v1  ;;  %vm3315_vm13 = vcmp.ne.s32.totalorder %v1397_v48, 0 }
 0x414   :  { %1285 = vrot.lane.b32.xlu0 %v1245_v5, %s1918_s16  ;;  %1287 = vrot.lane.b32.xlu1 %v1246_v40, %s1918_s16  ;;  %v3303_v26 = vand.u32 1, %v1661_v31  ;;  %vm3319_vm14 = vcmp.eq.s32.totalorder %v1513_v29, 0 }
 0x416   :  { %vm1663_vm15 = vcmp.eq.s32.totalorder %v3303_v26, 0 }
 0x418   :  { %1289 = vrot.lane.b32.xlu0 %v1247_v20, %s1918_s16  ;;  %1291 = vrot.lane.b32.xlu1 %v1248_v12, %s1918_s16 }
 0x41c   :  { %1293 = vrot.lane.b32.xlu0 %v1249_v54, %s1918_s16  ;;  %1295 = vrot.lane.b32.xlu1 %v1250_v4, %s1918_s16 }
 0x420   :  { %1297 = vrot.lane.b32.xlu0 %v1251_v56, %s1918_s16  ;;  %1299 = vrot.lane.b32.xlu1 %v1252_v39, %s1918_s16 }
 0x476   :  { %v1272_v23 = vpop.permute.xlu1 %1271  ;;  %v1270_v36 = vpop.permute.xlu0 %1269 }
 0x477   :  { %v1302_v35 = vsel %vm1301_vm10, %v1270_v36, %v1272_v23  ;;  %v1334_v38 = vsel %vm1301_vm10, %v1272_v23, %v1270_v36 }
 0x478   :  { %v1348_v60 = vsel %vm1346_vm11, %v1302_v35, %v1334_v38  ;;  %v1349_v32 = vsel %vm1347_vm12, %v1334_v38, %v1302_v35 }
 0x479   :  { %v1364_v47 = vsel %vm2934_vm5, %v1348_v60, %v2695_v9  ;;  %v1365_v28 = vsel %vm2934_vm5, %v1349_v32, %v2700_v44 }
 0x47a   :  { %v1380_v10 = vsel %vm2934_vm5, %v1365_v28, %v2695_v9  ;;  %v1381_v61 = vsel %vm2934_vm5, %v1364_v47, %v2700_v44  ;;  %v1276_v46 = vpop.permute.xlu1 %1275  ;;  %v1274_v33 = vpop.permute.xlu0 %1273 }
 0x47b   :  { %v1415_v41 = vrot.slane %v1380_v10, 1  ;;  %v1416_v5 = vrot.slane %v1381_v61, 1  ;;  %v1464_v40 = vrot.slane %v1380_v10, 7  ;;  %v1465_v52 = vrot.slane %v1381_v61, 7 }
 0x47c   :  { %v1303_v17 = vsel %vm1301_vm10, %v1274_v33, %v1276_v46  ;;  %v1335_v6 = vsel %vm1301_vm10, %v1276_v46, %v1274_v33 }
 0x47d   :  { %v1515_v25 = vsel %vm3319_vm14, %v1415_v41, %v1464_v40  ;;  %v1516_v9 = vsel %vm3319_vm14, %v1416_v5, %v1465_v52  ;;  %v1350_v44 = vsel %vm1346_vm11, %v1303_v17, %v1335_v6  ;;  %v1351_v18 = vsel %vm1347_vm12, %v1335_v6, %v1303_v17 }
 0x47e   :  { %v1531_v57 = vsel %vm3315_vm13, %v1515_v25, %v1380_v10  ;;  %v1532_v62 = vsel %vm3315_vm13, %v1516_v9, %v1381_v61  ;;  %v1366_v20 = vsel %vm2934_vm5, %v1350_v44, %v2716_v11  ;;  %v1367_v12 = vsel %vm2934_vm5, %v1351_v18, %v2720_v22  ;;  %v1280_v43 = vpop.permute.xlu1 %1279  ;;  %v1278_v63 = vpop.permute.xlu0 %1277 }
 0x47f   :  { %v1563_v58 = vrot.slane %v1531_v57, 2  ;;  %v1564_v59 = vrot.slane %v1532_v62, 2  ;;  %v1612_v7 = vrot.slane %v1531_v57, 6  ;;  %v1613_v0 = vrot.slane %v1532_v62, 6 }
 0x480   :  { %v1382_v54 = vsel %vm2934_vm5, %v1367_v12, %v2716_v11  ;;  %v1383_v4 = vsel %vm2934_vm5, %v1366_v20, %v2720_v22  ;;  %v1304_v14 = vsel %vm1301_vm10, %v1278_v63, %v1280_v43  ;;  %v1336_v37 = vsel %vm1301_vm10, %v1280_v43, %v1278_v63 }
 0x481   :  { %v1664_v56 = vsel %vm1663_vm15, %v1563_v58, %v1612_v7  ;;  %v1665_v39 = vsel %vm1663_vm15, %v1564_v59, %v1613_v0  ;;  %v1417_v27 = vrot.slane %v1382_v54, 1  ;;  %v1418_v55 = vrot.slane %v1383_v4, 1 }
 0x482   :  { %v1680_v1 = vsel %vm3315_vm13, %v1664_v56, %v1380_v10  ;;  %v1681_v11 = vsel %vm3315_vm13, %v1665_v39, %v1381_v61  ;;  %v1466_v31 = vrot.slane %v1382_v54, 7  ;;  %v1467_v22 = vrot.slane %v1383_v4, 7  ;;  %v1284_v47 = vpop.permute.xlu1 %1283  ;;  %v1282_v28 = vpop.permute.xlu0 %1281 }
 0x483   :  { %v1712_v29 = vrot.slane %v1680_v1, 4  ;;  %v1713_v23 = vrot.slane %v1681_v11, 4  ;;  %v1352_v36 = vsel %vm1346_vm11, %v1304_v14, %v1336_v37  ;;  %v1353_v48 = vsel %vm1347_vm12, %v1336_v37, %v1304_v14 }
 0x484   :  { %v1517_v35 = vsel %vm3319_vm14, %v1417_v27, %v1466_v31  ;;  %v1518_v38 = vsel %vm3319_vm14, %v1418_v55, %v1467_v22  ;;  %v1368_v60 = vsel %vm2934_vm5, %v1352_v36, %v2740_v15  ;;  %v1369_v32 = vsel %vm2934_vm5, %v1353_v48, %v2744_v24 }
 0x485   :  { %v1761_v46 = vsel %vm3315_vm13, %v1712_v29, %v1380_v10  ;;  %v1762_v33 = vsel %vm3315_vm13, %v1713_v23, %v1381_v61  ;;  %v1533_v41 = vsel %vm3315_vm13, %v1517_v35, %v1382_v54  ;;  %v1534_v5 = vsel %vm3315_vm13, %v1518_v38, %v1383_v4 }
 0x486   :  { %1777 = vst [vmem:[#allocation7] sm:$0xff] %v1761_v46  ;;  %1778 = vst [vmem:[#allocation7 + $0x8] sm:$0xff] %v1762_v33  ;;  %v1565_v40 = vrot.slane %v1533_v41, 2  ;;  %v1566_v52 = vrot.slane %v1534_v5, 2  ;;  %v1614_v17 = vrot.slane %v1533_v41, 6  ;;  %v1615_v6 = vrot.slane %v1534_v5, 6  ;;  %v1288_v56 = vpop.permute.xlu1 %1287  ;;  %v1286_v39 = vpop.permute.xlu0 %1285 }
 0x487   :  { %v1384_v25 = vsel %vm2934_vm5, %v1369_v32, %v2740_v15  ;;  %v1385_v10 = vsel %vm2934_vm5, %v1368_v60, %v2744_v24  ;;  %v1305_v61 = vsel %vm1301_vm10, %v1282_v28, %v1284_v47  ;;  %v1337_v9 = vsel %vm1301_vm10, %v1284_v47, %v1282_v28 }
 0x488   :  { %v1666_v44 = vsel %vm1663_vm15, %v1565_v40, %v1614_v17  ;;  %v1667_v18 = vsel %vm1663_vm15, %v1566_v52, %v1615_v6  ;;  %v1419_v57 = vrot.slane %v1384_v25, 1  ;;  %v1420_v62 = vrot.slane %v1385_v10, 1 }
 0x489   :  { %v1682_v20 = vsel %vm3315_vm13, %v1666_v44, %v1382_v54  ;;  %v1683_v15 = vsel %vm3315_vm13, %v1667_v18, %v1383_v4  ;;  %v1468_v12 = vrot.slane %v1384_v25, 7  ;;  %v1469_v24 = vrot.slane %v1385_v10, 7 }
 0x48a   :  { %v1714_v43 = vrot.slane %v1682_v20, 4  ;;  %v1715_v63 = vrot.slane %v1683_v15, 4  ;;  %v1354_v58 = vsel %vm1346_vm11, %v1305_v61, %v1337_v9  ;;  %v1355_v59 = vsel %vm1347_vm12, %v1337_v9, %v1305_v61  ;;  %v1292_v61 = vpop.permute.xlu1 %1291  ;;  %v1290_v9 = vpop.permute.xlu0 %1289 }
 0x48b   :  { %v1519_v7 = vsel %vm3319_vm14, %v1419_v57, %v1468_v12  ;;  %v1520_v0 = vsel %vm3319_vm14, %v1420_v62, %v1469_v24  ;;  %v1370_v14 = vsel %vm2934_vm5, %v1354_v58, %v2764_v51  ;;  %v1371_v37 = vsel %vm2934_vm5, %v1355_v59, %v2768_v21 }
 0x48c   :  { %v1763_v27 = vsel %vm3315_vm13, %v1714_v43, %v1382_v54  ;;  %v1764_v55 = vsel %vm3315_vm13, %v1715_v63, %v1383_v4  ;;  %v1535_v1 = vsel %vm3315_vm13, %v1519_v7, %v1384_v25  ;;  %v1536_v11 = vsel %vm3315_vm13, %v1520_v0, %v1385_v10 }
 0x48d   :  { %1779 = vst [vmem:[#allocation7 + $0x10] sm:$0xff] %v1763_v27  ;;  %1780 = vst [vmem:[#allocation7 + $0x18] sm:$0xff] %v1764_v55  ;;  %v1567_v31 = vrot.slane %v1535_v1, 2  ;;  %v1568_v22 = vrot.slane %v1536_v11, 2  ;;  %v1616_v29 = vrot.slane %v1535_v1, 6  ;;  %v1617_v23 = vrot.slane %v1536_v11, 6 }
 0x48e   :  { %v1386_v36 = vsel %vm2934_vm5, %v1371_v37, %v2764_v51  ;;  %v1387_v54 = vsel %vm2934_vm5, %v1370_v14, %v2768_v21  ;;  %v1306_v4 = vsel %vm1301_vm10, %v1286_v39, %v1288_v56  ;;  %v1338_v48 = vsel %vm1301_vm10, %v1288_v56, %v1286_v39 }
 0x48f   :  { %v1668_v35 = vsel %vm1663_vm15, %v1567_v31, %v1616_v29  ;;  %v1669_v38 = vsel %vm1663_vm15, %v1568_v22, %v1617_v23  ;;  %v1421_v60 = vrot.slane %v1386_v36, 1  ;;  %v1422_v32 = vrot.slane %v1387_v54, 1  ;;  %v1296_v29 = vpop.permute.xlu1 %1295  ;;  %v1294_v23 = vpop.permute.xlu0 %1293 }
 0x490   :  { %v1684_v47 = vsel %vm3315_vm13, %v1668_v35, %v1384_v25  ;;  %v1685_v51 = vsel %vm3315_vm13, %v1669_v38, %v1385_v10  ;;  %v1470_v28 = vrot.slane %v1386_v36, 7  ;;  %v1471_v21 = vrot.slane %v1387_v54, 7 }
 0x491   :  { %v1716_v46 = vrot.slane %v1684_v47, 4  ;;  %v1717_v33 = vrot.slane %v1685_v51, 4  ;;  %v1356_v41 = vsel %vm1346_vm11, %v1306_v4, %v1338_v48  ;;  %v1357_v5 = vsel %vm1347_vm12, %v1338_v48, %v1306_v4 }
 0x492   :  { %v1521_v40 = vsel %vm3319_vm14, %v1421_v60, %v1470_v28  ;;  %v1522_v52 = vsel %vm3319_vm14, %v1422_v32, %v1471_v21  ;;  %v1372_v17 = vsel %vm2934_vm5, %v1356_v41, %v2790_v16  ;;  %v1373_v6 = vsel %vm2934_vm5, %v1357_v5, %v2794_v45 }
 0x493   :  { %v1765_v44 = vsel %vm3315_vm13, %v1716_v46, %v1384_v25  ;;  %v1766_v18 = vsel %vm3315_vm13, %v1717_v33, %v1385_v10  ;;  %v1537_v57 = vsel %vm3315_vm13, %v1521_v40, %v1386_v36  ;;  %v1538_v62 = vsel %vm3315_vm13, %v1522_v52, %v1387_v54 }
 0x494   :  { %1781 = vst [vmem:[#allocation7 + $0x20] sm:$0xff] %v1765_v44  ;;  %1782 = vst [vmem:[#allocation7 + $0x28] sm:$0xff] %v1766_v18  ;;  %v1569_v20 = vrot.slane %v1537_v57, 2  ;;  %v1570_v15 = vrot.slane %v1538_v62, 2  ;;  %v1618_v12 = vrot.slane %v1537_v57, 6  ;;  %v1619_v24 = vrot.slane %v1538_v62, 6 }
 0x495   :  { %v1388_v43 = vsel %vm2934_vm5, %v1373_v6, %v2790_v16  ;;  %v1389_v25 = vsel %vm2934_vm5, %v1372_v17, %v2794_v45  ;;  %v1307_v10 = vsel %vm1301_vm10, %v1290_v9, %v1292_v61  ;;  %v1339_v63 = vsel %vm1301_vm10, %v1292_v61, %v1290_v9 }
 0x496   :  { %v1670_v58 = vsel %vm1663_vm15, %v1569_v20, %v1618_v12  ;;  %v1671_v59 = vsel %vm1663_vm15, %v1570_v15, %v1619_v24  ;;  %v1423_v7 = vrot.slane %v1388_v43, 1  ;;  %v1424_v0 = vrot.slane %v1389_v25, 1  ;;  %v1300_v20 = vpop.permute.xlu1 %1299  ;;  %v1298_v15 = vpop.permute.xlu0 %1297 }
 0x497   :  { %v1686_v14 = vsel %vm3315_vm13, %v1670_v58, %v1386_v36  ;;  %v1687_v16 = vsel %vm3315_vm13, %v1671_v59, %v1387_v54  ;;  %v1472_v37 = vrot.slane %v1388_v43, 7  ;;  %v1473_v45 = vrot.slane %v1389_v25, 7 }
 0x498   :  { %v1718_v56 = vrot.slane %v1686_v14, 4  ;;  %v1719_v39 = vrot.slane %v1687_v16, 4  ;;  %v1358_v27 = vsel %vm1346_vm11, %v1307_v10, %v1339_v63  ;;  %v1359_v55 = vsel %vm1347_vm12, %v1339_v63, %v1307_v10 }
 0x499   :  { %v1523_v1 = vsel %vm3319_vm14, %v1423_v7, %v1472_v37  ;;  %v1524_v11 = vsel %vm3319_vm14, %v1424_v0, %v1473_v45  ;;  %v1374_v31 = vsel %vm2934_vm5, %v1358_v27, %v2816_v34  ;;  %v1375_v22 = vsel %vm2934_vm5, %v1359_v55, %v2820_v3 }
 0x49a   :  { %v1767_v4 = vsel %vm3315_vm13, %v1718_v56, %v1386_v36  ;;  %v1768_v48 = vsel %vm3315_vm13, %v1719_v39, %v1387_v54  ;;  %v1539_v35 = vsel %vm3315_vm13, %v1523_v1, %v1388_v43  ;;  %v1540_v38 = vsel %vm3315_vm13, %v1524_v11, %v1389_v25 }
 0x49b   :  { %1783 = vst [vmem:[#allocation7 + $0x30] sm:$0xff] %v1767_v4  ;;  %1784 = vst [vmem:[#allocation7 + $0x38] sm:$0xff] %v1768_v48  ;;  %v1571_v60 = vrot.slane %v1539_v35, 2  ;;  %v1572_v32 = vrot.slane %v1540_v38, 2  ;;  %v1620_v47 = vrot.slane %v1539_v35, 6  ;;  %v1621_v51 = vrot.slane %v1540_v38, 6 }
 0x49c   :  { %v1390_v28 = vsel %vm2934_vm5, %v1375_v22, %v2816_v34  ;;  %v1391_v36 = vsel %vm2934_vm5, %v1374_v31, %v2820_v3  ;;  %v1308_v54 = vsel %vm1301_vm10, %v1294_v23, %v1296_v29  ;;  %v1340_v21 = vsel %vm1301_vm10, %v1296_v29, %v1294_v23 }
 0x49d   :  { %v1672_v46 = vsel %vm1663_vm15, %v1571_v60, %v1620_v47  ;;  %v1673_v33 = vsel %vm1663_vm15, %v1572_v32, %v1621_v51  ;;  %v1425_v41 = vrot.slane %v1390_v28, 1  ;;  %v1426_v5 = vrot.slane %v1391_v36, 1 }
 0x49e   :  { %v1688_v40 = vsel %vm3315_vm13, %v1672_v46, %v1388_v43  ;;  %v1689_v34 = vsel %vm3315_vm13, %v1673_v33, %v1389_v25  ;;  %v1474_v52 = vrot.slane %v1390_v28, 7  ;;  %v1475_v3 = vrot.slane %v1391_v36, 7 }
 0x49f   :  { %v1720_v17 = vrot.slane %v1688_v40, 4  ;;  %v1721_v6 = vrot.slane %v1689_v34, 4  ;;  %v1360_v61 = vsel %vm1346_vm11, %v1308_v54, %v1340_v21  ;;  %v1361_v9 = vsel %vm1347_vm12, %v1340_v21, %v1308_v54 }
 0x4a0   :  { %v1525_v44 = vsel %vm3319_vm14, %v1425_v41, %v1474_v52  ;;  %v1526_v18 = vsel %vm3319_vm14, %v1426_v5, %v1475_v3  ;;  %v1376_v57 = vsel %vm2934_vm5, %v1360_v61, %v2842_v19  ;;  %v1377_v62 = vsel %vm2934_vm5, %v1361_v9, %v2846_v53 }
 0x4a1   :  { %v1769_v12 = vsel %vm3315_vm13, %v1720_v17, %v1388_v43  ;;  %v1770_v24 = vsel %vm3315_vm13, %v1721_v6, %v1389_v25  ;;  %v1541_v10 = vsel %vm3315_vm13, %v1525_v44, %v1390_v28  ;;  %v1542_v63 = vsel %vm3315_vm13, %v1526_v18, %v1391_v36 }
 0x4a2   :  { %1785 = vst [vmem:[#allocation7 + $0x40] sm:$0xff] %v1769_v12  ;;  %1786 = vst [vmem:[#allocation7 + $0x48] sm:$0xff] %v1770_v24  ;;  %v1573_v58 = vrot.slane %v1541_v10, 2  ;;  %v1574_v59 = vrot.slane %v1542_v63, 2  ;;  %v1622_v7 = vrot.slane %v1541_v10, 6  ;;  %v1623_v0 = vrot.slane %v1542_v63, 6 }
 0x4a3   :  { %v1392_v14 = vsel %vm2934_vm5, %v1377_v62, %v2842_v19  ;;  %v1393_v43 = vsel %vm2934_vm5, %v1376_v57, %v2846_v53  ;;  %v1309_v25 = vsel %vm1301_vm10, %v1298_v15, %v1300_v20  ;;  %v1341_v16 = vsel %vm1301_vm10, %v1300_v20, %v1298_v15 }
 0x4a4   :  { %v1674_v37 = vsel %vm1663_vm15, %v1573_v58, %v1622_v7  ;;  %v1675_v45 = vsel %vm1663_vm15, %v1574_v59, %v1623_v0  ;;  %v1427_v56 = vrot.slane %v1392_v14, 1  ;;  %v1428_v39 = vrot.slane %v1393_v43, 1 }
 0x4a5   :  { %v1690_v27 = vsel %vm3315_vm13, %v1674_v37, %v1390_v28  ;;  %v1691_v19 = vsel %vm3315_vm13, %v1675_v45, %v1391_v36  ;;  %v1476_v55 = vrot.slane %v1392_v14, 7  ;;  %v1477_v53 = vrot.slane %v1393_v43, 7 }
 0x4a6   :  { %v1722_v1 = vrot.slane %v1690_v27, 4  ;;  %v1723_v11 = vrot.slane %v1691_v19, 4  ;;  %v1362_v31 = vsel %vm1346_vm11, %v1309_v25, %v1341_v16  ;;  %v1363_v22 = vsel %vm1347_vm12, %v1341_v16, %v1309_v25 }
 0x4a7   :  { %v1527_v29 = vsel %vm3319_vm14, %v1427_v56, %v1476_v55  ;;  %v1528_v23 = vsel %vm3319_vm14, %v1428_v39, %v1477_v53  ;;  %v1378_v4 = vsel %vm2934_vm5, %v1362_v31, %v2858_v2  ;;  %v1379_v48 = vsel %vm2934_vm5, %v1363_v22, %v2862_v13 }
 0x4a8   :  { %v1771_v30 = vsel %vm3315_vm13, %v1722_v1, %v1390_v28  ;;  %v1772_v50 = vsel %vm3315_vm13, %v1723_v11, %v1391_v36  ;;  %v1543_v35 = vsel %vm3315_vm13, %v1527_v29, %v1392_v14  ;;  %v1544_v38 = vsel %vm3315_vm13, %v1528_v23, %v1393_v43 }
 0x4a9   :  { %1787 = vst [vmem:[#allocation7 + $0x50] sm:$0xff] %v1771_v30  ;;  %1788 = vst [vmem:[#allocation7 + $0x58] sm:$0xff] %v1772_v50  ;;  %v1575_v60 = vrot.slane %v1543_v35, 2  ;;  %v1576_v32 = vrot.slane %v1544_v38, 2  ;;  %v1624_v47 = vrot.slane %v1543_v35, 6  ;;  %v1625_v51 = vrot.slane %v1544_v38, 6 }
 0x4aa   :  { %v1394_v54 = vsel %vm2934_vm5, %v1379_v48, %v2858_v2  ;;  %v1395_v28 = vsel %vm2934_vm5, %v1378_v4, %v2862_v13 }
 0x4ab   :  { %v1676_v36 = vsel %vm1663_vm15, %v1575_v60, %v1624_v47  ;;  %v1677_v21 = vsel %vm1663_vm15, %v1576_v32, %v1625_v51  ;;  %v1429_v46 = vrot.slane %v1394_v54, 1  ;;  %v1430_v33 = vrot.slane %v1395_v28, 1 }
 0x4ac   :  { %v1692_v41 = vsel %vm3315_vm13, %v1676_v36, %v1392_v14  ;;  %v1693_v5 = vsel %vm3315_vm13, %v1677_v21, %v1393_v43  ;;  %v1478_v40 = vrot.slane %v1394_v54, 7  ;;  %v1479_v2 = vrot.slane %v1395_v28, 7 }
 0x4ad   :  { %v1724_v34 = vrot.slane %v1692_v41, 4  ;;  %v1725_v52 = vrot.slane %v1693_v5, 4 }
 0x4ae   :  { %v1529_v13 = vsel %vm3319_vm14, %v1429_v46, %v1478_v40  ;;  %v1530_v8 = vsel %vm3319_vm14, %v1430_v33, %v1479_v2 }
 0x4af   :  { %v1773_v3 = vsel %vm3315_vm13, %v1724_v34, %v1392_v14  ;;  %v1774_v17 = vsel %vm3315_vm13, %v1725_v52, %v1393_v43  ;;  %v1545_v6 = vsel %vm3315_vm13, %v1529_v13, %v1394_v54  ;;  %v1546_v61 = vsel %vm3315_vm13, %v1530_v8, %v1395_v28 }
 0x4b0   :  { %1789 = vst [vmem:[#allocation7 + $0x60] sm:$0xff] %v1773_v3  ;;  %1790 = vst [vmem:[#allocation7 + $0x68] sm:$0xff] %v1774_v17  ;;  %v1577_v9 = vrot.slane %v1545_v6, 2  ;;  %v1578_v44 = vrot.slane %v1546_v61, 2  ;;  %v1626_v18 = vrot.slane %v1545_v6, 6  ;;  %v1627_v57 = vrot.slane %v1546_v61, 6 }
 0x4b2   :  { %v1678_v42 = vsel %vm1663_vm15, %v1577_v9, %v1626_v18  ;;  %v1679_v62 = vsel %vm1663_vm15, %v1578_v44, %v1627_v57 }
 0x4b3   :  { %v1694_v20 = vsel %vm3315_vm13, %v1678_v42, %v1394_v54  ;;  %v1695_v15 = vsel %vm3315_vm13, %v1679_v62, %v1395_v28 }
 0x4b4   :  { %v1726_v12 = vrot.slane %v1694_v20, 4  ;;  %v1727_v24 = vrot.slane %v1695_v15, 4 }
 0x4b6   :  { %v1775_v10 = vsel %vm3315_vm13, %v1726_v12, %v1394_v54  ;;  %v1776_v63 = vsel %vm3315_vm13, %v1727_v24, %v1395_v28 }
 0x4b7   :  { %1791 = vst [vmem:[#allocation7 + $0x70] sm:$0xff] %v1775_v10  ;;  %1792 = vst [vmem:[#allocation7 + $0x78] sm:$0xff] %v1776_v63 }
 0x4b8   :  { %1886 = shalt.err (!%p1883_p1)
}
 0x4b9   :  { %s1887_s23 = scalar_lea.hbm %s3633_s2, 2048 }
 0x4ba   :  { %p1888_p2 = scmp.ne.s32.totalorder %s3633_s2, %s1887_s23  ;;  %p1891_p3 = scmp.lt.u32.totalorder %s1887_s23, %s3633_s2 }
 0x4bc   :  { %p1893_p4 = pnand %p1891_p3, %p1888_p2 }
 0x4be   :  { %1896 = shalt.err (!%p1893_p4)
}
 0x4bf   :  { %1804 = dma.vmem_to_hbm [thread:$0]  %s1799_s19, 2048, %s3633_s2, [#allocation6], %s1905_s28, %s1905_s28, %s1906_s29  }
 0x4c0   :  { %1901 = dma.done.wait [#allocation6], 2048  }
 0x4c1   :  { %1902 = vsyncadd [#allocation6], 4294965248 }
 0x4c2   :  { %1808 = vsyncpa [#allocation5], 1 }
 0x4c3   :  { %1809 = vsyncpa [#allocation6], 1 }

</bundles_post_ra>
